<compile_context>
chip_gen: v6e
topology: v6e:2x2x1
jax: 0.10.0
libtpu: 0.0.40
codegen_flags: <defaults>
</compile_context>

<pallas_src>
import functools
import math

import jax
import jax.numpy as jnp
from jax import lax
from jax.experimental import pallas as pl
from jax.experimental.pallas import tpu as pltpu

_NEG_INF = -1e9
_BN_EPS = 1e-5
_VMEM = pl.BlockSpec(memory_space=pltpu.MemorySpace.VMEM)
_SMEM = pl.BlockSpec(memory_space=pltpu.MemorySpace.SMEM)


# ----------------------------------------------------------------------------
# In-kernel helpers
# ----------------------------------------------------------------------------
def _bn(y, gamma, beta, eps):
    """Training-mode BatchNorm1d over the node axis (biased variance)."""
    mean = jnp.mean(y, axis=0, keepdims=True)
    diff = y - mean
    var = jnp.mean(diff * diff, axis=0, keepdims=True)
    return diff * lax.rsqrt(var + eps) * gamma + beta


# ----------------------------------------------------------------------------
# Pallas kernels
# ----------------------------------------------------------------------------
def _encoder_kernel(x_ref, rwse_ref, e_ref, nw_ref, nb_ref, rw_ref, rb_ref,
                    ew_ref, eb_ref, hx_ref, he_ref):
    hx = jnp.dot(x_ref[...], nw_ref[...], preferred_element_type=jnp.float32) + nb_ref[...]
    hx = hx + jnp.dot(rwse_ref[...], rw_ref[...], preferred_element_type=jnp.float32) + rb_ref[...]
    hx_ref[...] = hx.astype(hx_ref.dtype)
    he = jnp.dot(e_ref[...], ew_ref[...], preferred_element_type=jnp.float32) + eb_ref[...]
    he_ref[...] = he.astype(he_ref.dtype)


def _gine_kernel(eps_ref, x_ref, e_ref, src_ref, dst_ref,
                 w1_ref, b1_ref, w2_ref, b2_ref, g_ref, beta_ref, o_ref, *, bn_eps):
    x = x_ref[...]                                   # [N, D]
    n = x_ref.shape[0]
    e = e_ref.shape[0]

    # One-hot gather/scatter matrices built in VMEM from the edge index vectors
    # (only O(E) int32 comes from HBM; the [E,N]/[N,E] one-hots never touch HBM).
    col = lax.broadcasted_iota(jnp.int32, (e, n), 1)
    src_oh = (src_ref[...] == col).astype(jnp.float32)            # [E, N]
    row = lax.broadcasted_iota(jnp.int32, (n, e), 0)
    dst_oh = (dst_ref[...] == row).astype(jnp.float32)            # [N, E]

    x_src = jnp.dot(src_oh, x, preferred_element_type=jnp.float32)        # gather      [E, D]
    msg = jnp.maximum(x_src + e_ref[...], 0.0)                            # ReLU(x_j + e_ji)
    agg = jnp.dot(dst_oh, msg, preferred_element_type=jnp.float32)        # scatter-add [N, D]

    eps = eps_ref[0, 0]
    h = (1.0 + eps) * x + agg
    h = jnp.maximum(
        jnp.dot(h, w1_ref[...], preferred_element_type=jnp.float32) + b1_ref[...], 0.0)
    h = jnp.dot(h, w2_ref[...], preferred_element_type=jnp.float32) + b2_ref[...]
    y = x + h                                                              # residual
    o_ref[...] = _bn(y, g_ref[...], beta_ref[...], bn_eps).astype(o_ref.dtype)


def _attn_kernel(x_ref, bcol_ref, brow_ref, wqkv_ref, bqkv_ref, wo_ref, bo_ref,
                 g_ref, beta_ref, o_ref, *, nhead, bn_eps):
    x = x_ref[...]                                   # [N, D]
    n, d = x_ref.shape
    dh = d // nhead
    scale = 1.0 / math.sqrt(dh)

    # Fused QKV projection: one [D, 3D] matmul instead of three skinny ones.
    qkv = jnp.dot(x, wqkv_ref[...], preferred_element_type=jnp.float32) + bqkv_ref[...]

    # Per-graph attention mask built in-kernel from the batch vector (cheap VPU compare,
    # no dense [N,N] f32 mask is ever read from HBM).
    same_graph = bcol_ref[...] == brow_ref[...]      # [N, N] bool

    outs = []
    for h in range(nhead):                           # static unrolled loop over heads
        q = qkv[:, h * dh:(h + 1) * dh]
        k = qkv[:, d + h * dh:d + (h + 1) * dh]
        v = qkv[:, 2 * d + h * dh:2 * d + (h + 1) * dh]
        # contract the head dim directly (no explicit k.T transpose)
        s = lax.dot_general(q, k, (((1,), (1,)), ((), ())),
                            preferred_element_type=jnp.float32) * scale
        s = jnp.where(same_graph, s, _NEG_INF)
        s = s - jnp.max(s, axis=-1, keepdims=True)
        p_attn = jnp.exp(s)
        denom = jnp.sum(p_attn, axis=-1, keepdims=True)
        p_attn = p_attn * pl.reciprocal(denom, approx=True)
        outs.append(jnp.dot(p_attn, v, preferred_element_type=jnp.float32))

    o = jnp.concatenate(outs, axis=-1)               # [N, D] lane-dense
    attn = jnp.dot(o, wo_ref[...], preferred_element_type=jnp.float32) + bo_ref[...]
    y = x + attn                                     # residual
    o_ref[...] = _bn(y, g_ref[...], beta_ref[...], bn_eps).astype(o_ref.dtype)


def _ffn_kernel(hl_ref, ha_ref, w1_ref, b1_ref, w2_ref, b2_ref, g_ref, beta_ref, o_ref,
                *, bn_eps):
    h = hl_ref[...] + ha_ref[...]
    h2 = jnp.maximum(
        jnp.dot(h, w1_ref[...], preferred_element_type=jnp.float32) + b1_ref[...], 0.0)
    h2 = jnp.dot(h2, w2_ref[...], preferred_element_type=jnp.float32) + b2_ref[...]
    y = h + h2                                       # residual
    o_ref[...] = _bn(y, g_ref[...], beta_ref[...], bn_eps).astype(o_ref.dtype)


# ----------------------------------------------------------------------------
# Wrappers (one pallas_call each)
# ----------------------------------------------------------------------------
def feature_encoder(x, edge_attr, rwse, p):
    n = x.shape[0]
    e = edge_attr.shape[0]
    d = p["node_w"].shape[1]
    return pl.pallas_call(
        _encoder_kernel,
        in_specs=[_VMEM] * 9,
        out_specs=(_VMEM, _VMEM),
        out_shape=(jax.ShapeDtypeStruct((n, d), jnp.float32),
                   jax.ShapeDtypeStruct((e, d), jnp.float32)),
    )(x, rwse, edge_attr,
      p["node_w"], p["node_b"].reshape(1, -1),
      p["rwse_w"], p["rwse_b"].reshape(1, -1),
      p["edge_w"], p["edge_b"].reshape(1, -1))


def gine_local_block(x, edge_attr, src_col, dst_row, p):
    n, d = x.shape
    eps = jnp.asarray(p["gine_eps"], jnp.float32).reshape(1, 1)
    return pl.pallas_call(
        functools.partial(_gine_kernel, bn_eps=_BN_EPS),
        in_specs=[_SMEM] + [_VMEM] * 10,
        out_specs=_VMEM,
        out_shape=jax.ShapeDtypeStruct((n, d), jnp.float32),
    )(eps, x, edge_attr, src_col, dst_row,
      p["gine_w1"], p["gine_b1"].reshape(1, -1),
      p["gine_w2"], p["gine_b2"].reshape(1, -1),
      p["bn_local_g"].reshape(1, -1), p["bn_local_b"].reshape(1, -1))


def attn_block(x, batch_col, batch_row, p, nhead):
    n, d = x.shape
    return pl.pallas_call(
        functools.partial(_attn_kernel, nhead=nhead, bn_eps=_BN_EPS),
        in_specs=[_VMEM] * 9,
        out_specs=_VMEM,
        out_shape=jax.ShapeDtypeStruct((n, d), jnp.float32),
    )(x, batch_col, batch_row,
      p["wqkv"], p["bqkv"].reshape(1, -1),
      p["wo"], p["bo"].reshape(1, -1),
      p["bn_attn_g"].reshape(1, -1), p["bn_attn_b"].reshape(1, -1))


def ffn_block(h_local, h_attn, p):
    n, d = h_local.shape
    return pl.pallas_call(
        functools.partial(_ffn_kernel, bn_eps=_BN_EPS),
        in_specs=[_VMEM] * 8,
        out_specs=_VMEM,
        out_shape=jax.ShapeDtypeStruct((n, d), jnp.float32),
    )(h_local, h_attn,
      p["ff_w1"], p["ff_b1"].reshape(1, -1),
      p["ff_w2"], p["ff_b2"].reshape(1, -1),
      p["bn2_g"].reshape(1, -1), p["bn2_b"].reshape(1, -1))


# ----------------------------------------------------------------------------
# Model orchestration (plain JAX glue)
# ----------------------------------------------------------------------------
def gps_layer(x, edge_attr, src_col, dst_row, batch_col, batch_row, p, nhead, last=False):
    del last  # `last` flag does not change the forward math here
    h_local = gine_local_block(x, edge_attr, src_col, dst_row, p)   # local MPNN branch
    h_attn = attn_block(x, batch_col, batch_row, p, nhead)          # global attention branch
    h = ffn_block(h_local, h_attn, p)                               # combine + FFN
    return h, edge_attr                                             # GINE keeps edge features


def gps_encoder_forward(params, x, edge_index, edge_attr, rwse, batch, *, nhead):
    n = x.shape[0]
    e = edge_attr.shape[0]
    src_col = edge_index[0].astype(jnp.int32).reshape(e, 1)
    dst_row = edge_index[1].astype(jnp.int32).reshape(1, e)
    batch_i32 = batch.astype(jnp.int32)
    batch_col = batch_i32.reshape(n, 1)
    batch_row = batch_i32.reshape(1, n)

    hx, he = feature_encoder(x, edge_attr, rwse, params["encoder"])
    n_layers = len(params["layers"])
    for li, p in enumerate(params["layers"]):
        hx, he = gps_layer(hx, he, src_col, dst_row, batch_col, batch_row, p, nhead,
                           last=(li == n_layers - 1))
    return hx, batch


# ----------------------------------------------------------------------------
# Deterministic parameter initialization
# ----------------------------------------------------------------------------
def _glorot(key, shape):
    fan_in, fan_out = shape
    limit = math.sqrt(6.0 / (fan_in + fan_out))
    return jax.random.uniform(key, shape, jnp.float32, -limit, limit)


def init_params(key, d_model, nhead, num_layer, f_node, f_edge, f_rwse):
    del nhead  # head count is a static config, not a parameter leaf
    keys = jax.random.split(key, 3 + num_layer)
    enc = {
        "node_w": _glorot(keys[0], (f_node, d_model)), "node_b": jnp.zeros((d_model,), jnp.float32),
        "rwse_w": _glorot(keys[1], (f_rwse, d_model)), "rwse_b": jnp.zeros((d_model,), jnp.float32),
        "edge_w": _glorot(keys[2], (f_edge, d_model)), "edge_b": jnp.zeros((d_model,), jnp.float32),
    }
    layers = []
    for li in range(num_layer):
        lk = jax.random.split(keys[3 + li], 8)
        wq = _glorot(lk[2], (d_model, d_model))
        wk = _glorot(lk[3], (d_model, d_model))
        wv = _glorot(lk[4], (d_model, d_model))
        layers.append({
            "gine_eps": jnp.zeros((), jnp.float32),
            "gine_w1": _glorot(lk[0], (d_model, d_model)), "gine_b1": jnp.zeros((d_model,), jnp.float32),
            "gine_w2": _glorot(lk[1], (d_model, d_model)), "gine_b2": jnp.zeros((d_model,), jnp.float32),
            # fused QKV projection (matches nn.MultiheadAttention's in_proj layout)
            "wqkv": jnp.concatenate([wq, wk, wv], axis=1),
            "bqkv": jnp.zeros((3 * d_model,), jnp.float32),
            "wo": _glorot(lk[5], (d_model, d_model)), "bo": jnp.zeros((d_model,), jnp.float32),
            "ff_w1": _glorot(lk[6], (d_model, 2 * d_model)), "ff_b1": jnp.zeros((2 * d_model,), jnp.float32),
            "ff_w2": _glorot(lk[7], (2 * d_model, d_model)), "ff_b2": jnp.zeros((d_model,), jnp.float32),
            "bn_local_g": jnp.ones((d_model,), jnp.float32), "bn_local_b": jnp.zeros((d_model,), jnp.float32),
            "bn_attn_g": jnp.ones((d_model,), jnp.float32), "bn_attn_b": jnp.zeros((d_model,), jnp.float32),
            "bn2_g": jnp.ones((d_model,), jnp.float32), "bn2_b": jnp.zeros((d_model,), jnp.float32),
        })
    return {"encoder": enc, "layers": layers}


# ----------------------------------------------------------------------------
# Demo
# ----------------------------------------------------------------------------
if __name__ == "__main__":
    D_MODEL, NHEAD, NUM_LAYER = 32, 4, 2
    N_NODES, N_EDGES = 16, 32
    F_NODE, F_EDGE, F_RWSE = 8, 6, 8

    key = jax.random.PRNGKey(0)
    k_param, k_x, k_e, k_rw, k_src, k_dst = jax.random.split(key, 6)

    params = init_params(k_param, D_MODEL, NHEAD, NUM_LAYER, F_NODE, F_EDGE, F_RWSE)

    x = jax.random.normal(k_x, (N_NODES, F_NODE), jnp.float32)
    edge_attr = jax.random.normal(k_e, (N_EDGES, F_EDGE), jnp.float32)
    rwse = jax.random.uniform(k_rw, (N_NODES, F_RWSE), jnp.float32)
    # two graphs of 8 nodes each; edges stay within their graph
    batch = jnp.concatenate([jnp.zeros((8,), jnp.int32), jnp.ones((8,), jnp.int32)])
    src_a = jax.random.randint(k_src, (N_EDGES // 2,), 0, 8, jnp.int32)
    dst_a = jax.random.randint(k_dst, (N_EDGES // 2,), 0, 8, jnp.int32)
    src = jnp.concatenate([src_a, src_a + 8])
    dst = jnp.concatenate([dst_a, dst_a + 8])
    edge_index = jnp.stack([src, dst], axis=0)

    fwd = jax.jit(functools.partial(gps_encoder_forward, nhead=NHEAD))
    out_x, out_batch = fwd(params, x, edge_index, edge_attr, rwse, batch)
    jax.block_until_ready(out_x)
    jax.block_until_ready(out_batch)

    assert out_x.shape == (N_NODES, D_MODEL)
    assert out_batch.shape == (N_NODES,)
    assert bool(jnp.all(jnp.isfinite(out_x)))
    print("KERNEL_OK")
</pallas_src>

<mosaic_0001>
module attributes {stable_mosaic.version = 11 : i64} {
  func.func @_encoder_kernel(%arg0: memref<16x8xf32, #tpu.memory_space<vmem>>, %arg1: memref<16x8xf32, #tpu.memory_space<vmem>>, %arg2: memref<32x6xf32, #tpu.memory_space<vmem>>, %arg3: memref<8x32xf32, #tpu.memory_space<vmem>>, %arg4: memref<1x32xf32, #tpu.memory_space<vmem>>, %arg5: memref<8x32xf32, #tpu.memory_space<vmem>>, %arg6: memref<1x32xf32, #tpu.memory_space<vmem>>, %arg7: memref<6x32xf32, #tpu.memory_space<vmem>>, %arg8: memref<1x32xf32, #tpu.memory_space<vmem>>, %arg9: memref<16x32xf32, #tpu.memory_space<vmem>>, %arg10: memref<32x32xf32, #tpu.memory_space<vmem>>) attributes {dimension_semantics = [], scalar_prefetch = 0 : i64, scratch_operands = 0 : i64, tpu.core_type = #tpu.core_type<tc>} {
    %c0 = arith.constant 0 : index
    %c0_0 = arith.constant 0 : index
    %0 = vector.load %arg0[%c0, %c0_0] : memref<16x8xf32, #tpu.memory_space<vmem>>, vector<16x8xf32>
    %c0_1 = arith.constant 0 : index
    %c0_2 = arith.constant 0 : index
    %1 = vector.load %arg3[%c0_1, %c0_2] : memref<8x32xf32, #tpu.memory_space<vmem>>, vector<8x32xf32>
    %cst = arith.constant dense<0.000000e+00> : vector<16x32xf32>
    %2 = tpu.matmul %0, %1, %cst {dimension_numbers = #tpu.dot_dimension_numbers<[1], [0], [0], [1], [0, 0, 1, 1], [], []>} : vector<16x8xf32>, vector<8x32xf32>, vector<16x32xf32> -> vector<16x32xf32>
    %c0_3 = arith.constant 0 : index
    %c0_4 = arith.constant 0 : index
    %3 = vector.load %arg4[%c0_3, %c0_4] : memref<1x32xf32, #tpu.memory_space<vmem>>, vector<1x32xf32>
    %4 = vector.broadcast %3 : vector<1x32xf32> to vector<16x32xf32>
    %5 = arith.addf %2, %4 : vector<16x32xf32>
    %c0_5 = arith.constant 0 : index
    %c0_6 = arith.constant 0 : index
    %6 = vector.load %arg1[%c0_5, %c0_6] : memref<16x8xf32, #tpu.memory_space<vmem>>, vector<16x8xf32>
    %c0_7 = arith.constant 0 : index
    %c0_8 = arith.constant 0 : index
    %7 = vector.load %arg5[%c0_7, %c0_8] : memref<8x32xf32, #tpu.memory_space<vmem>>, vector<8x32xf32>
    %cst_9 = arith.constant dense<0.000000e+00> : vector<16x32xf32>
    %8 = tpu.matmul %6, %7, %cst_9 {dimension_numbers = #tpu.dot_dimension_numbers<[1], [0], [0], [1], [0, 0, 1, 1], [], []>} : vector<16x8xf32>, vector<8x32xf32>, vector<16x32xf32> -> vector<16x32xf32>
    %9 = arith.addf %5, %8 : vector<16x32xf32>
    %c0_10 = arith.constant 0 : index
    %c0_11 = arith.constant 0 : index
    %10 = vector.load %arg6[%c0_10, %c0_11] : memref<1x32xf32, #tpu.memory_space<vmem>>, vector<1x32xf32>
    %11 = vector.broadcast %10 : vector<1x32xf32> to vector<16x32xf32>
    %12 = arith.addf %9, %11 : vector<16x32xf32>
    %c0_12 = arith.constant 0 : index
    %c0_13 = arith.constant 0 : index
    %13 = vector.load %arg9[%c0_12, %c0_13] : memref<16x32xf32, #tpu.memory_space<vmem>>, vector<16x32xf32>
    tpu.vector_store %arg9[%c0_12, %c0_13], %12 {strides = array<i32>} : memref<16x32xf32, #tpu.memory_space<vmem>>, vector<16x32xf32>,
    %c0_14 = arith.constant 0 : index
    %c0_15 = arith.constant 0 : index
    %14 = vector.load %arg2[%c0_14, %c0_15] : memref<32x6xf32, #tpu.memory_space<vmem>>, vector<32x6xf32>
    %c0_16 = arith.constant 0 : index
    %c0_17 = arith.constant 0 : index
    %15 = vector.load %arg7[%c0_16, %c0_17] : memref<6x32xf32, #tpu.memory_space<vmem>>, vector<6x32xf32>
    %cst_18 = arith.constant dense<0.000000e+00> : vector<32x32xf32>
    %16 = tpu.matmul %14, %15, %cst_18 {dimension_numbers = #tpu.dot_dimension_numbers<[1], [0], [0], [1], [0, 0, 1, 1], [], []>} : vector<32x6xf32>, vector<6x32xf32>, vector<32x32xf32> -> vector<32x32xf32>
    %c0_19 = arith.constant 0 : index
    %c0_20 = arith.constant 0 : index
    %17 = vector.load %arg8[%c0_19, %c0_20] : memref<1x32xf32, #tpu.memory_space<vmem>>, vector<1x32xf32>
    %18 = vector.broadcast %17 : vector<1x32xf32> to vector<32x32xf32>
    %19 = arith.addf %16, %18 : vector<32x32xf32>
    %c0_21 = arith.constant 0 : index
    %c0_22 = arith.constant 0 : index
    %20 = vector.load %arg10[%c0_21, %c0_22] : memref<32x32xf32, #tpu.memory_space<vmem>>, vector<32x32xf32>
    tpu.vector_store %arg10[%c0_21, %c0_22], %19 {strides = array<i32>} : memref<32x32xf32, #tpu.memory_space<vmem>>, vector<32x32xf32>,
    return
  }
}

module attributes {stable_mosaic.version = 11 : i64} {
  func.func @_ffn_kernel(%arg0: memref<16x32xf32, #tpu.memory_space<vmem>>, %arg1: memref<16x32xf32, #tpu.memory_space<vmem>>, %arg2: memref<32x64xf32, #tpu.memory_space<vmem>>, %arg3: memref<1x64xf32, #tpu.memory_space<vmem>>, %arg4: memref<64x32xf32, #tpu.memory_space<vmem>>, %arg5: memref<1x32xf32, #tpu.memory_space<vmem>>, %arg6: memref<1x32xf32, #tpu.memory_space<vmem>>, %arg7: memref<1x32xf32, #tpu.memory_space<vmem>>, %arg8: memref<16x32xf32, #tpu.memory_space<vmem>>) attributes {dimension_semantics = [], scalar_prefetch = 0 : i64, scratch_operands = 0 : i64, tpu.core_type = #tpu.core_type<tc>} {
    %c0 = arith.constant 0 : index
    %c0_0 = arith.constant 0 : index
    %0 = vector.load %arg0[%c0, %c0_0] : memref<16x32xf32, #tpu.memory_space<vmem>>, vector<16x32xf32>
    %c0_1 = arith.constant 0 : index
    %c0_2 = arith.constant 0 : index
    %1 = vector.load %arg1[%c0_1, %c0_2] : memref<16x32xf32, #tpu.memory_space<vmem>>, vector<16x32xf32>
    %2 = arith.addf %0, %1 : vector<16x32xf32>
    %c0_3 = arith.constant 0 : index
    %c0_4 = arith.constant 0 : index
    %3 = vector.load %arg2[%c0_3, %c0_4] : memref<32x64xf32, #tpu.memory_space<vmem>>, vector<32x64xf32>
    %cst = arith.constant dense<0.000000e+00> : vector<16x64xf32>
    %4 = tpu.matmul %2, %3, %cst {dimension_numbers = #tpu.dot_dimension_numbers<[1], [0], [0], [1], [0, 0, 1, 1], [], []>} : vector<16x32xf32>, vector<32x64xf32>, vector<16x64xf32> -> vector<16x64xf32>
    %c0_5 = arith.constant 0 : index
    %c0_6 = arith.constant 0 : index
    %5 = vector.load %arg3[%c0_5, %c0_6] : memref<1x64xf32, #tpu.memory_space<vmem>>, vector<1x64xf32>
    %6 = vector.broadcast %5 : vector<1x64xf32> to vector<16x64xf32>
    %7 = arith.addf %4, %6 : vector<16x64xf32>
    %cst_7 = arith.constant 0.000000e+00 : f32
    %8 = vector.broadcast %cst_7 : f32 to vector<16x64xf32>
    %9 = arith.maximumf %7, %8 : vector<16x64xf32>
    %c0_8 = arith.constant 0 : index
    %c0_9 = arith.constant 0 : index
    %10 = vector.load %arg4[%c0_8, %c0_9] : memref<64x32xf32, #tpu.memory_space<vmem>>, vector<64x32xf32>
    %cst_10 = arith.constant dense<0.000000e+00> : vector<16x32xf32>
    %11 = tpu.matmul %9, %10, %cst_10 {dimension_numbers = #tpu.dot_dimension_numbers<[1], [0], [0], [1], [0, 0, 1, 1], [], []>} : vector<16x64xf32>, vector<64x32xf32>, vector<16x32xf32> -> vector<16x32xf32>
    %c0_11 = arith.constant 0 : index
    %c0_12 = arith.constant 0 : index
    %12 = vector.load %arg5[%c0_11, %c0_12] : memref<1x32xf32, #tpu.memory_space<vmem>>, vector<1x32xf32>
    %13 = vector.broadcast %12 : vector<1x32xf32> to vector<16x32xf32>
    %14 = arith.addf %11, %13 : vector<16x32xf32>
    %15 = arith.addf %2, %14 : vector<16x32xf32>
    %c0_13 = arith.constant 0 : index
    %c0_14 = arith.constant 0 : index
    %16 = vector.load %arg6[%c0_13, %c0_14] : memref<1x32xf32, #tpu.memory_space<vmem>>, vector<1x32xf32>
    %c0_15 = arith.constant 0 : index
    %c0_16 = arith.constant 0 : index
    %17 = vector.load %arg7[%c0_15, %c0_16] : memref<1x32xf32, #tpu.memory_space<vmem>>, vector<1x32xf32>
    %cst_17 = arith.constant dense<0.000000e+00> : vector<32xf32>
    %18 = vector.multi_reduction <add>, %15, %cst_17 [0] : vector<16x32xf32> to vector<32xf32>
    %19 = vector.shape_cast %18 : vector<32xf32> to vector<1x32xf32>
    %cst_18 = arith.constant 1.600000e+01 : f32
    %20 = vector.broadcast %cst_18 : f32 to vector<1x32xf32>
    %21 = arith.divf %19, %20 : vector<1x32xf32>
    %22 = vector.broadcast %21 : vector<1x32xf32> to vector<16x32xf32>
    %23 = arith.subf %15, %22 : vector<16x32xf32>
    %24 = arith.mulf %23, %23 : vector<16x32xf32>
    %cst_19 = arith.constant dense<0.000000e+00> : vector<32xf32>
    %25 = vector.multi_reduction <add>, %24, %cst_19 [0] : vector<16x32xf32> to vector<32xf32>
    %26 = vector.shape_cast %25 : vector<32xf32> to vector<1x32xf32>
    %cst_20 = arith.constant 1.600000e+01 : f32
    %27 = vector.broadcast %cst_20 : f32 to vector<1x32xf32>
    %28 = arith.divf %26, %27 : vector<1x32xf32>
    %cst_21 = arith.constant 9.99999974E-6 : f32
    %29 = vector.broadcast %cst_21 : f32 to vector<1x32xf32>
    %30 = arith.addf %28, %29 : vector<1x32xf32>
    %31 = math.rsqrt %30 : vector<1x32xf32>
    %32 = vector.broadcast %31 : vector<1x32xf32> to vector<16x32xf32>
    %33 = arith.mulf %23, %32 : vector<16x32xf32>
    %34 = vector.broadcast %16 : vector<1x32xf32> to vector<16x32xf32>
    %35 = arith.mulf %33, %34 : vector<16x32xf32>
    %36 = vector.broadcast %17 : vector<1x32xf32> to vector<16x32xf32>
    %37 = arith.addf %35, %36 : vector<16x32xf32>
    %c0_22 = arith.constant 0 : index
    %c0_23 = arith.constant 0 : index
    %38 = vector.load %arg8[%c0_22, %c0_23] : memref<16x32xf32, #tpu.memory_space<vmem>>, vector<16x32xf32>
    tpu.vector_store %arg8[%c0_22, %c0_23], %37 {strides = array<i32>} : memref<16x32xf32, #tpu.memory_space<vmem>>, vector<16x32xf32>,
    return
  }
}

module attributes {stable_mosaic.version = 11 : i64} {
  func.func @_gine_kernel(%arg0: memref<1x1xf32, #tpu.memory_space<smem>>, %arg1: memref<16x32xf32, #tpu.memory_space<vmem>>, %arg2: memref<32x32xf32, #tpu.memory_space<vmem>>, %arg3: memref<32x1xi32, #tpu.memory_space<vmem>>, %arg4: memref<1x32xi32, #tpu.memory_space<vmem>>, %arg5: memref<32x32xf32, #tpu.memory_space<vmem>>, %arg6: memref<1x32xf32, #tpu.memory_space<vmem>>, %arg7: memref<32x32xf32, #tpu.memory_space<vmem>>, %arg8: memref<1x32xf32, #tpu.memory_space<vmem>>, %arg9: memref<1x32xf32, #tpu.memory_space<vmem>>, %arg10: memref<1x32xf32, #tpu.memory_space<vmem>>, %arg11: memref<16x32xf32, #tpu.memory_space<vmem>>) attributes {dimension_semantics = [], scalar_prefetch = 0 : i64, scratch_operands = 0 : i64, tpu.core_type = #tpu.core_type<tc>} {
    %c0 = arith.constant 0 : index
    %c0_0 = arith.constant 0 : index
    %0 = vector.load %arg1[%c0, %c0_0] : memref<16x32xf32, #tpu.memory_space<vmem>>, vector<16x32xf32>
    %1 = tpu.iota {dimensions = array<i32: 1>} : vector<32x16xi32>
    %c0_1 = arith.constant 0 : index
    %c0_2 = arith.constant 0 : index
    %2 = vector.load %arg3[%c0_1, %c0_2] : memref<32x1xi32, #tpu.memory_space<vmem>>, vector<32x1xi32>
    %3 = vector.broadcast %2 : vector<32x1xi32> to vector<32x16xi32>
    %4 = arith.cmpi eq, %3, %1 : vector<32x16xi32>
    %5 = arith.extui %4 : vector<32x16xi1> to vector<32x16xi32>
    %6 = arith.sitofp %5 : vector<32x16xi32> to vector<32x16xf32>
    %7 = tpu.iota {dimensions = array<i32: 0>} : vector<16x32xi32>
    %c0_3 = arith.constant 0 : index
    %c0_4 = arith.constant 0 : index
    %8 = vector.load %arg4[%c0_3, %c0_4] : memref<1x32xi32, #tpu.memory_space<vmem>>, vector<1x32xi32>
    %9 = vector.broadcast %8 : vector<1x32xi32> to vector<16x32xi32>
    %10 = arith.cmpi eq, %9, %7 : vector<16x32xi32>
    %11 = arith.extui %10 : vector<16x32xi1> to vector<16x32xi32>
    %12 = arith.sitofp %11 : vector<16x32xi32> to vector<16x32xf32>
    %cst = arith.constant dense<0.000000e+00> : vector<32x32xf32>
    %13 = tpu.matmul %6, %0, %cst {dimension_numbers = #tpu.dot_dimension_numbers<[1], [0], [0], [1], [0, 0, 1, 1], [], []>} : vector<32x16xf32>, vector<16x32xf32>, vector<32x32xf32> -> vector<32x32xf32>
    %c0_5 = arith.constant 0 : index
    %c0_6 = arith.constant 0 : index
    %14 = vector.load %arg2[%c0_5, %c0_6] : memref<32x32xf32, #tpu.memory_space<vmem>>, vector<32x32xf32>
    %15 = arith.addf %13, %14 : vector<32x32xf32>
    %cst_7 = arith.constant 0.000000e+00 : f32
    %16 = vector.broadcast %cst_7 : f32 to vector<32x32xf32>
    %17 = arith.maximumf %15, %16 : vector<32x32xf32>
    %cst_8 = arith.constant dense<0.000000e+00> : vector<16x32xf32>
    %18 = tpu.matmul %12, %17, %cst_8 {dimension_numbers = #tpu.dot_dimension_numbers<[1], [0], [0], [1], [0, 0, 1, 1], [], []>} : vector<16x32xf32>, vector<32x32xf32>, vector<16x32xf32> -> vector<16x32xf32>
    %c0_9 = arith.constant 0 : index
    %c0_10 = arith.constant 0 : index
    %19 = memref.load %arg0[%c0_9, %c0_10] : memref<1x1xf32, #tpu.memory_space<smem>>
    %cst_11 = arith.constant 1.000000e+00 : f32
    %20 = arith.addf %cst_11, %19 : f32
    %21 = vector.broadcast %20 : f32 to vector<16x32xf32>
    %22 = arith.mulf %21, %0 : vector<16x32xf32>
    %23 = arith.addf %22, %18 : vector<16x32xf32>
    %c0_12 = arith.constant 0 : index
    %c0_13 = arith.constant 0 : index
    %24 = vector.load %arg5[%c0_12, %c0_13] : memref<32x32xf32, #tpu.memory_space<vmem>>, vector<32x32xf32>
    %cst_14 = arith.constant dense<0.000000e+00> : vector<16x32xf32>
    %25 = tpu.matmul %23, %24, %cst_14 {dimension_numbers = #tpu.dot_dimension_numbers<[1], [0], [0], [1], [0, 0, 1, 1], [], []>} : vector<16x32xf32>, vector<32x32xf32>, vector<16x32xf32> -> vector<16x32xf32>
    %c0_15 = arith.constant 0 : index
    %c0_16 = arith.constant 0 : index
    %26 = vector.load %arg6[%c0_15, %c0_16] : memref<1x32xf32, #tpu.memory_space<vmem>>, vector<1x32xf32>
    %27 = vector.broadcast %26 : vector<1x32xf32> to vector<16x32xf32>
    %28 = arith.addf %25, %27 : vector<16x32xf32>
    %cst_17 = arith.constant 0.000000e+00 : f32
    %29 = vector.broadcast %cst_17 : f32 to vector<16x32xf32>
    %30 = arith.maximumf %28, %29 : vector<16x32xf32>
    %c0_18 = arith.constant 0 : index
    %c0_19 = arith.constant 0 : index
    %31 = vector.load %arg7[%c0_18, %c0_19] : memref<32x32xf32, #tpu.memory_space<vmem>>, vector<32x32xf32>
    %cst_20 = arith.constant dense<0.000000e+00> : vector<16x32xf32>
    %32 = tpu.matmul %30, %31, %cst_20 {dimension_numbers = #tpu.dot_dimension_numbers<[1], [0], [0], [1], [0, 0, 1, 1], [], []>} : vector<16x32xf32>, vector<32x32xf32>, vector<16x32xf32> -> vector<16x32xf32>
    %c0_21 = arith.constant 0 : index
    %c0_22 = arith.constant 0 : index
    %33 = vector.load %arg8[%c0_21, %c0_22] : memref<1x32xf32, #tpu.memory_space<vmem>>, vector<1x32xf32>
    %34 = vector.broadcast %33 : vector<1x32xf32> to vector<16x32xf32>
    %35 = arith.addf %32, %34 : vector<16x32xf32>
    %36 = arith.addf %0, %35 : vector<16x32xf32>
    %c0_23 = arith.constant 0 : index
    %c0_24 = arith.constant 0 : index
    %37 = vector.load %arg9[%c0_23, %c0_24] : memref<1x32xf32, #tpu.memory_space<vmem>>, vector<1x32xf32>
    %c0_25 = arith.constant 0 : index
    %c0_26 = arith.constant 0 : index
    %38 = vector.load %arg10[%c0_25, %c0_26] : memref<1x32xf32, #tpu.memory_space<vmem>>, vector<1x32xf32>
    %cst_27 = arith.constant dense<0.000000e+00> : vector<32xf32>
    %39 = vector.multi_reduction <add>, %36, %cst_27 [0] : vector<16x32xf32> to vector<32xf32>
    %40 = vector.shape_cast %39 : vector<32xf32> to vector<1x32xf32>
    %cst_28 = arith.constant 1.600000e+01 : f32
    %41 = vector.broadcast %cst_28 : f32 to vector<1x32xf32>
    %42 = arith.divf %40, %41 : vector<1x32xf32>
    %43 = vector.broadcast %42 : vector<1x32xf32> to vector<16x32xf32>
    %44 = arith.subf %36, %43 : vector<16x32xf32>
    %45 = arith.mulf %44, %44 : vector<16x32xf32>
    %cst_29 = arith.constant dense<0.000000e+00> : vector<32xf32>
    %46 = vector.multi_reduction <add>, %45, %cst_29 [0] : vector<16x32xf32> to vector<32xf32>
    %47 = vector.shape_cast %46 : vector<32xf32> to vector<1x32xf32>
    %cst_30 = arith.constant 1.600000e+01 : f32
    %48 = vector.broadcast %cst_30 : f32 to vector<1x32xf32>
    %49 = arith.divf %47, %48 : vector<1x32xf32>
    %cst_31 = arith.constant 9.99999974E-6 : f32
    %50 = vector.broadcast %cst_31 : f32 to vector<1x32xf32>
    %51 = arith.addf %49, %50 : vector<1x32xf32>
    %52 = math.rsqrt %51 : vector<1x32xf32>
    %53 = vector.broadcast %52 : vector<1x32xf32> to vector<16x32xf32>
    %54 = arith.mulf %44, %53 : vector<16x32xf32>
    %55 = vector.broadcast %37 : vector<1x32xf32> to vector<16x32xf32>
    %56 = arith.mulf %54, %55 : vector<16x32xf32>
    %57 = vector.broadcast %38 : vector<1x32xf32> to vector<16x32xf32>
    %58 = arith.addf %56, %57 : vector<16x32xf32>
    %c0_32 = arith.constant 0 : index
    %c0_33 = arith.constant 0 : index
    %59 = vector.load %arg11[%c0_32, %c0_33] : memref<16x32xf32, #tpu.memory_space<vmem>>, vector<16x32xf32>
    tpu.vector_store %arg11[%c0_32, %c0_33], %58 {strides = array<i32>} : memref<16x32xf32, #tpu.memory_space<vmem>>, vector<16x32xf32>,
    return
  }
}

module attributes {stable_mosaic.version = 11 : i64} {
  func.func @_attn_kernel(%arg0: memref<16x32xf32, #tpu.memory_space<vmem>>, %arg1: memref<16x1xi32, #tpu.memory_space<vmem>>, %arg2: memref<1x16xi32, #tpu.memory_space<vmem>>, %arg3: memref<32x96xf32, #tpu.memory_space<vmem>>, %arg4: memref<1x96xf32, #tpu.memory_space<vmem>>, %arg5: memref<32x32xf32, #tpu.memory_space<vmem>>, %arg6: memref<1x32xf32, #tpu.memory_space<vmem>>, %arg7: memref<1x32xf32, #tpu.memory_space<vmem>>, %arg8: memref<1x32xf32, #tpu.memory_space<vmem>>, %arg9: memref<16x32xf32, #tpu.memory_space<vmem>>) attributes {dimension_semantics = [], scalar_prefetch = 0 : i64, scratch_operands = 0 : i64, tpu.core_type = #tpu.core_type<tc>} {
    %c0 = arith.constant 0 : index
    %c0_0 = arith.constant 0 : index
    %0 = vector.load %arg0[%c0, %c0_0] : memref<16x32xf32, #tpu.memory_space<vmem>>, vector<16x32xf32>
    %c0_1 = arith.constant 0 : index
    %c0_2 = arith.constant 0 : index
    %1 = vector.load %arg3[%c0_1, %c0_2] : memref<32x96xf32, #tpu.memory_space<vmem>>, vector<32x96xf32>
    %cst = arith.constant dense<0.000000e+00> : vector<16x96xf32>
    %2 = tpu.matmul %0, %1, %cst {dimension_numbers = #tpu.dot_dimension_numbers<[1], [0], [0], [1], [0, 0, 1, 1], [], []>} : vector<16x32xf32>, vector<32x96xf32>, vector<16x96xf32> -> vector<16x96xf32>
    %c0_3 = arith.constant 0 : index
    %c0_4 = arith.constant 0 : index
    %3 = vector.load %arg4[%c0_3, %c0_4] : memref<1x96xf32, #tpu.memory_space<vmem>>, vector<1x96xf32>
    %4 = vector.broadcast %3 : vector<1x96xf32> to vector<16x96xf32>
    %5 = arith.addf %2, %4 : vector<16x96xf32>
    %c0_5 = arith.constant 0 : index
    %c0_6 = arith.constant 0 : index
    %6 = vector.load %arg1[%c0_5, %c0_6] : memref<16x1xi32, #tpu.memory_space<vmem>>, vector<16x1xi32>
    %c0_7 = arith.constant 0 : index
    %c0_8 = arith.constant 0 : index
    %7 = vector.load %arg2[%c0_7, %c0_8] : memref<1x16xi32, #tpu.memory_space<vmem>>, vector<1x16xi32>
    %8 = vector.broadcast %6 : vector<16x1xi32> to vector<16x16xi32>
    %9 = vector.broadcast %7 : vector<1x16xi32> to vector<16x16xi32>
    %10 = arith.cmpi eq, %8, %9 : vector<16x16xi32>
    %11 = vector.extract_strided_slice %5 {offsets = [0, 0], sizes = [16, 8], strides = [1, 1]} : vector<16x96xf32> to vector<16x8xf32>
    %12 = vector.extract_strided_slice %5 {offsets = [0, 32], sizes = [16, 8], strides = [1, 1]} : vector<16x96xf32> to vector<16x8xf32>
    %13 = vector.extract_strided_slice %5 {offsets = [0, 64], sizes = [16, 8], strides = [1, 1]} : vector<16x96xf32> to vector<16x8xf32>
    %cst_9 = arith.constant dense<0.000000e+00> : vector<16x16xf32>
    %14 = tpu.matmul %11, %12, %cst_9 {dimension_numbers = #tpu.dot_dimension_numbers<[1], [1], [0], [0], [0, 0, 1, 0], [], []>} : vector<16x8xf32>, vector<16x8xf32>, vector<16x16xf32> -> vector<16x16xf32>
    %cst_10 = arith.constant 0.353553385 : f32
    %15 = vector.broadcast %cst_10 : f32 to vector<16x16xf32>
    %16 = arith.mulf %14, %15 : vector<16x16xf32>
    %cst_11 = arith.constant -1.000000e+09 : f32
    %17 = vector.broadcast %cst_11 : f32 to vector<16x16xf32>
    %18 = arith.select %10, %16, %17 : vector<16x16xi1>, vector<16x16xf32>
    %cst_12 = arith.constant dense<0xFF800000> : vector<16xf32>
    %19 = vector.multi_reduction <maximumf>, %18, %cst_12 [1] : vector<16x16xf32> to vector<16xf32>
    %20 = vector.shape_cast %19 : vector<16xf32> to vector<16x1xf32>
    %21 = vector.broadcast %20 : vector<16x1xf32> to vector<16x16xf32>
    %22 = arith.subf %18, %21 : vector<16x16xf32>
    %23 = math.exp %22 : vector<16x16xf32>
    %cst_13 = arith.constant dense<0.000000e+00> : vector<16xf32>
    %24 = vector.multi_reduction <add>, %23, %cst_13 [1] : vector<16x16xf32> to vector<16xf32>
    %25 = vector.shape_cast %24 : vector<16xf32> to vector<16x1xf32>
    %26 = tpu.reciprocal %25 {approx = true} : vector<16x1xf32> -> vector<16x1xf32>
    %27 = vector.broadcast %26 : vector<16x1xf32> to vector<16x16xf32>
    %28 = arith.mulf %23, %27 : vector<16x16xf32>
    %cst_14 = arith.constant dense<0.000000e+00> : vector<16x8xf32>
    %29 = tpu.matmul %28, %13, %cst_14 {dimension_numbers = #tpu.dot_dimension_numbers<[1], [0], [0], [1], [0, 0, 1, 1], [], []>} : vector<16x16xf32>, vector<16x8xf32>, vector<16x8xf32> -> vector<16x8xf32>
    %30 = vector.extract_strided_slice %5 {offsets = [0, 8], sizes = [16, 8], strides = [1, 1]} : vector<16x96xf32> to vector<16x8xf32>
    %31 = vector.extract_strided_slice %5 {offsets = [0, 40], sizes = [16, 8], strides = [1, 1]} : vector<16x96xf32> to vector<16x8xf32>
    %32 = vector.extract_strided_slice %5 {offsets = [0, 72], sizes = [16, 8], strides = [1, 1]} : vector<16x96xf32> to vector<16x8xf32>
    %cst_15 = arith.constant dense<0.000000e+00> : vector<16x16xf32>
    %33 = tpu.matmul %30, %31, %cst_15 {dimension_numbers = #tpu.dot_dimension_numbers<[1], [1], [0], [0], [0, 0, 1, 0], [], []>} : vector<16x8xf32>, vector<16x8xf32>, vector<16x16xf32> -> vector<16x16xf32>
    %cst_16 = arith.constant 0.353553385 : f32
    %34 = vector.broadcast %cst_16 : f32 to vector<16x16xf32>
    %35 = arith.mulf %33, %34 : vector<16x16xf32>
    %cst_17 = arith.constant -1.000000e+09 : f32
    %36 = vector.broadcast %cst_17 : f32 to vector<16x16xf32>
    %37 = arith.select %10, %35, %36 : vector<16x16xi1>, vector<16x16xf32>
    %cst_18 = arith.constant dense<0xFF800000> : vector<16xf32>
    %38 = vector.multi_reduction <maximumf>, %37, %cst_18 [1] : vector<16x16xf32> to vector<16xf32>
    %39 = vector.shape_cast %38 : vector<16xf32> to vector<16x1xf32>
    %40 = vector.broadcast %39 : vector<16x1xf32> to vector<16x16xf32>
    %41 = arith.subf %37, %40 : vector<16x16xf32>
    %42 = math.exp %41 : vector<16x16xf32>
    %cst_19 = arith.constant dense<0.000000e+00> : vector<16xf32>
    %43 = vector.multi_reduction <add>, %42, %cst_19 [1] : vector<16x16xf32> to vector<16xf32>
    %44 = vector.shape_cast %43 : vector<16xf32> to vector<16x1xf32>
    %45 = tpu.reciprocal %44 {approx = true} : vector<16x1xf32> -> vector<16x1xf32>
    %46 = vector.broadcast %45 : vector<16x1xf32> to vector<16x16xf32>
    %47 = arith.mulf %42, %46 : vector<16x16xf32>
    %cst_20 = arith.constant dense<0.000000e+00> : vector<16x8xf32>
    %48 = tpu.matmul %47, %32, %cst_20 {dimension_numbers = #tpu.dot_dimension_numbers<[1], [0], [0], [1], [0, 0, 1, 1], [], []>} : vector<16x16xf32>, vector<16x8xf32>, vector<16x8xf32> -> vector<16x8xf32>
    %49 = vector.extract_strided_slice %5 {offsets = [0, 16], sizes = [16, 8], strides = [1, 1]} : vector<16x96xf32> to vector<16x8xf32>
    %50 = vector.extract_strided_slice %5 {offsets = [0, 48], sizes = [16, 8], strides = [1, 1]} : vector<16x96xf32> to vector<16x8xf32>
    %51 = vector.extract_strided_slice %5 {offsets = [0, 80], sizes = [16, 8], strides = [1, 1]} : vector<16x96xf32> to vector<16x8xf32>
    %cst_21 = arith.constant dense<0.000000e+00> : vector<16x16xf32>
    %52 = tpu.matmul %49, %50, %cst_21 {dimension_numbers = #tpu.dot_dimension_numbers<[1], [1], [0], [0], [0, 0, 1, 0], [], []>} : vector<16x8xf32>, vector<16x8xf32>, vector<16x16xf32> -> vector<16x16xf32>
    %cst_22 = arith.constant 0.353553385 : f32
    %53 = vector.broadcast %cst_22 : f32 to vector<16x16xf32>
    %54 = arith.mulf %52, %53 : vector<16x16xf32>
    %cst_23 = arith.constant -1.000000e+09 : f32
    %55 = vector.broadcast %cst_23 : f32 to vector<16x16xf32>
    %56 = arith.select %10, %54, %55 : vector<16x16xi1>, vector<16x16xf32>
    %cst_24 = arith.constant dense<0xFF800000> : vector<16xf32>
    %57 = vector.multi_reduction <maximumf>, %56, %cst_24 [1] : vector<16x16xf32> to vector<16xf32>
    %58 = vector.shape_cast %57 : vector<16xf32> to vector<16x1xf32>
    %59 = vector.broadcast %58 : vector<16x1xf32> to vector<16x16xf32>
    %60 = arith.subf %56, %59 : vector<16x16xf32>
    %61 = math.exp %60 : vector<16x16xf32>
    %cst_25 = arith.constant dense<0.000000e+00> : vector<16xf32>
    %62 = vector.multi_reduction <add>, %61, %cst_25 [1] : vector<16x16xf32> to vector<16xf32>
    %63 = vector.shape_cast %62 : vector<16xf32> to vector<16x1xf32>
    %64 = tpu.reciprocal %63 {approx = true} : vector<16x1xf32> -> vector<16x1xf32>
    %65 = vector.broadcast %64 : vector<16x1xf32> to vector<16x16xf32>
    %66 = arith.mulf %61, %65 : vector<16x16xf32>
    %cst_26 = arith.constant dense<0.000000e+00> : vector<16x8xf32>
    %67 = tpu.matmul %66, %51, %cst_26 {dimension_numbers = #tpu.dot_dimension_numbers<[1], [0], [0], [1], [0, 0, 1, 1], [], []>} : vector<16x16xf32>, vector<16x8xf32>, vector<16x8xf32> -> vector<16x8xf32>
    %68 = vector.extract_strided_slice %5 {offsets = [0, 24], sizes = [16, 8], strides = [1, 1]} : vector<16x96xf32> to vector<16x8xf32>
    %69 = vector.extract_strided_slice %5 {offsets = [0, 56], sizes = [16, 8], strides = [1, 1]} : vector<16x96xf32> to vector<16x8xf32>
    %70 = vector.extract_strided_slice %5 {offsets = [0, 88], sizes = [16, 8], strides = [1, 1]} : vector<16x96xf32> to vector<16x8xf32>
    %cst_27 = arith.constant dense<0.000000e+00> : vector<16x16xf32>
    %71 = tpu.matmul %68, %69, %cst_27 {dimension_numbers = #tpu.dot_dimension_numbers<[1], [1], [0], [0], [0, 0, 1, 0], [], []>} : vector<16x8xf32>, vector<16x8xf32>, vector<16x16xf32> -> vector<16x16xf32>
    %cst_28 = arith.constant 0.353553385 : f32
    %72 = vector.broadcast %cst_28 : f32 to vector<16x16xf32>
    %73 = arith.mulf %71, %72 : vector<16x16xf32>
    %cst_29 = arith.constant -1.000000e+09 : f32
    %74 = vector.broadcast %cst_29 : f32 to vector<16x16xf32>
    %75 = arith.select %10, %73, %74 : vector<16x16xi1>, vector<16x16xf32>
    %cst_30 = arith.constant dense<0xFF800000> : vector<16xf32>
    %76 = vector.multi_reduction <maximumf>, %75, %cst_30 [1] : vector<16x16xf32> to vector<16xf32>
    %77 = vector.shape_cast %76 : vector<16xf32> to vector<16x1xf32>
    %78 = vector.broadcast %77 : vector<16x1xf32> to vector<16x16xf32>
    %79 = arith.subf %75, %78 : vector<16x16xf32>
    %80 = math.exp %79 : vector<16x16xf32>
    %cst_31 = arith.constant dense<0.000000e+00> : vector<16xf32>
    %81 = vector.multi_reduction <add>, %80, %cst_31 [1] : vector<16x16xf32> to vector<16xf32>
    %82 = vector.shape_cast %81 : vector<16xf32> to vector<16x1xf32>
    %83 = tpu.reciprocal %82 {approx = true} : vector<16x1xf32> -> vector<16x1xf32>
    %84 = vector.broadcast %83 : vector<16x1xf32> to vector<16x16xf32>
    %85 = arith.mulf %80, %84 : vector<16x16xf32>
    %cst_32 = arith.constant dense<0.000000e+00> : vector<16x8xf32>
    %86 = tpu.matmul %85, %70, %cst_32 {dimension_numbers = #tpu.dot_dimension_numbers<[1], [0], [0], [1], [0, 0, 1, 1], [], []>} : vector<16x16xf32>, vector<16x8xf32>, vector<16x8xf32> -> vector<16x8xf32>
    %87 = tpu.concatenate %29, %48, %67, %86 in 1 : vector<16x8xf32>, vector<16x8xf32>, vector<16x8xf32>, vector<16x8xf32> -> vector<16x32xf32>
    %c0_33 = arith.constant 0 : index
    %c0_34 = arith.constant 0 : index
    %88 = vector.load %arg5[%c0_33, %c0_34] : memref<32x32xf32, #tpu.memory_space<vmem>>, vector<32x32xf32>
    %cst_35 = arith.constant dense<0.000000e+00> : vector<16x32xf32>
    %89 = tpu.matmul %87, %88, %cst_35 {dimension_numbers = #tpu.dot_dimension_numbers<[1], [0], [0], [1], [0, 0, 1, 1], [], []>} : vector<16x32xf32>, vector<32x32xf32>, vector<16x32xf32> -> vector<16x32xf32>
    %c0_36 = arith.constant 0 : index
    %c0_37 = arith.constant 0 : index
    %90 = vector.load %arg6[%c0_36, %c0_37] : memref<1x32xf32, #tpu.memory_space<vmem>>, vector<1x32xf32>
    %91 = vector.broadcast %90 : vector<1x32xf32> to vector<16x32xf32>
    %92 = arith.addf %89, %91 : vector<16x32xf32>
    %93 = arith.addf %0, %92 : vector<16x32xf32>
    %c0_38 = arith.constant 0 : index
    %c0_39 = arith.constant 0 : index
    %94 = vector.load %arg7[%c0_38, %c0_39] : memref<1x32xf32, #tpu.memory_space<vmem>>, vector<1x32xf32>
    %c0_40 = arith.constant 0 : index
    %c0_41 = arith.constant 0 : index
    %95 = vector.load %arg8[%c0_40, %c0_41] : memref<1x32xf32, #tpu.memory_space<vmem>>, vector<1x32xf32>
    %cst_42 = arith.constant dense<0.000000e+00> : vector<32xf32>
    %96 = vector.multi_reduction <add>, %93, %cst_42 [0] : vector<16x32xf32> to vector<32xf32>
    %97 = vector.shape_cast %96 : vector<32xf32> to vector<1x32xf32>
    %cst_43 = arith.constant 1.600000e+01 : f32
    %98 = vector.broadcast %cst_43 : f32 to vector<1x32xf32>
    %99 = arith.divf %97, %98 : vector<1x32xf32>
    %100 = vector.broadcast %99 : vector<1x32xf32> to vector<16x32xf32>
    %101 = arith.subf %93, %100 : vector<16x32xf32>
    %102 = arith.mulf %101, %101 : vector<16x32xf32>
    %cst_44 = arith.constant dense<0.000000e+00> : vector<32xf32>
    %103 = vector.multi_reduction <add>, %102, %cst_44 [0] : vector<16x32xf32> to vector<32xf32>
    %104 = vector.shape_cast %103 : vector<32xf32> to vector<1x32xf32>
    %cst_45 = arith.constant 1.600000e+01 : f32
    %105 = vector.broadcast %cst_45 : f32 to vector<1x32xf32>
    %106 = arith.divf %104, %105 : vector<1x32xf32>
    %cst_46 = arith.constant 9.99999974E-6 : f32
    %107 = vector.broadcast %cst_46 : f32 to vector<1x32xf32>
    %108 = arith.addf %106, %107 : vector<1x32xf32>
    %109 = math.rsqrt %108 : vector<1x32xf32>
    %110 = vector.broadcast %109 : vector<1x32xf32> to vector<16x32xf32>
    %111 = arith.mulf %101, %110 : vector<16x32xf32>
    %112 = vector.broadcast %94 : vector<1x32xf32> to vector<16x32xf32>
    %113 = arith.mulf %111, %112 : vector<16x32xf32>
    %114 = vector.broadcast %95 : vector<1x32xf32> to vector<16x32xf32>
    %115 = arith.addf %113, %114 : vector<16x32xf32>
    %c0_47 = arith.constant 0 : index
    %c0_48 = arith.constant 0 : index
    %116 = vector.load %arg9[%c0_47, %c0_48] : memref<16x32xf32, #tpu.memory_space<vmem>>, vector<16x32xf32>
    tpu.vector_store %arg9[%c0_47, %c0_48], %115 {strides = array<i32>} : memref<16x32xf32, #tpu.memory_space<vmem>>, vector<16x32xf32>,
    return
  }
}

module attributes {stable_mosaic.version = 11 : i64} {
  func.func @_ffn_kernel(%arg0: memref<16x32xf32, #tpu.memory_space<vmem>>, %arg1: memref<16x32xf32, #tpu.memory_space<vmem>>, %arg2: memref<32x64xf32, #tpu.memory_space<vmem>>, %arg3: memref<1x64xf32, #tpu.memory_space<vmem>>, %arg4: memref<64x32xf32, #tpu.memory_space<vmem>>, %arg5: memref<1x32xf32, #tpu.memory_space<vmem>>, %arg6: memref<1x32xf32, #tpu.memory_space<vmem>>, %arg7: memref<1x32xf32, #tpu.memory_space<vmem>>, %arg8: memref<16x32xf32, #tpu.memory_space<vmem>>) attributes {dimension_semantics = [], scalar_prefetch = 0 : i64, scratch_operands = 0 : i64, tpu.core_type = #tpu.core_type<tc>} {
    %c0 = arith.constant 0 : index
    %c0_0 = arith.constant 0 : index
    %0 = vector.load %arg0[%c0, %c0_0] : memref<16x32xf32, #tpu.memory_space<vmem>>, vector<16x32xf32>
    %c0_1 = arith.constant 0 : index
    %c0_2 = arith.constant 0 : index
    %1 = vector.load %arg1[%c0_1, %c0_2] : memref<16x32xf32, #tpu.memory_space<vmem>>, vector<16x32xf32>
    %2 = arith.addf %0, %1 : vector<16x32xf32>
    %c0_3 = arith.constant 0 : index
    %c0_4 = arith.constant 0 : index
    %3 = vector.load %arg2[%c0_3, %c0_4] : memref<32x64xf32, #tpu.memory_space<vmem>>, vector<32x64xf32>
    %cst = arith.constant dense<0.000000e+00> : vector<16x64xf32>
    %4 = tpu.matmul %2, %3, %cst {dimension_numbers = #tpu.dot_dimension_numbers<[1], [0], [0], [1], [0, 0, 1, 1], [], []>} : vector<16x32xf32>, vector<32x64xf32>, vector<16x64xf32> -> vector<16x64xf32>
    %c0_5 = arith.constant 0 : index
    %c0_6 = arith.constant 0 : index
    %5 = vector.load %arg3[%c0_5, %c0_6] : memref<1x64xf32, #tpu.memory_space<vmem>>, vector<1x64xf32>
    %6 = vector.broadcast %5 : vector<1x64xf32> to vector<16x64xf32>
    %7 = arith.addf %4, %6 : vector<16x64xf32>
    %cst_7 = arith.constant 0.000000e+00 : f32
    %8 = vector.broadcast %cst_7 : f32 to vector<16x64xf32>
    %9 = arith.maximumf %7, %8 : vector<16x64xf32>
    %c0_8 = arith.constant 0 : index
    %c0_9 = arith.constant 0 : index
    %10 = vector.load %arg4[%c0_8, %c0_9] : memref<64x32xf32, #tpu.memory_space<vmem>>, vector<64x32xf32>
    %cst_10 = arith.constant dense<0.000000e+00> : vector<16x32xf32>
    %11 = tpu.matmul %9, %10, %cst_10 {dimension_numbers = #tpu.dot_dimension_numbers<[1], [0], [0], [1], [0, 0, 1, 1], [], []>} : vector<16x64xf32>, vector<64x32xf32>, vector<16x32xf32> -> vector<16x32xf32>
    %c0_11 = arith.constant 0 : index
    %c0_12 = arith.constant 0 : index
    %12 = vector.load %arg5[%c0_11, %c0_12] : memref<1x32xf32, #tpu.memory_space<vmem>>, vector<1x32xf32>
    %13 = vector.broadcast %12 : vector<1x32xf32> to vector<16x32xf32>
    %14 = arith.addf %11, %13 : vector<16x32xf32>
    %15 = arith.addf %2, %14 : vector<16x32xf32>
    %c0_13 = arith.constant 0 : index
    %c0_14 = arith.constant 0 : index
    %16 = vector.load %arg6[%c0_13, %c0_14] : memref<1x32xf32, #tpu.memory_space<vmem>>, vector<1x32xf32>
    %c0_15 = arith.constant 0 : index
    %c0_16 = arith.constant 0 : index
    %17 = vector.load %arg7[%c0_15, %c0_16] : memref<1x32xf32, #tpu.memory_space<vmem>>, vector<1x32xf32>
    %cst_17 = arith.constant dense<0.000000e+00> : vector<32xf32>
    %18 = vector.multi_reduction <add>, %15, %cst_17 [0] : vector<16x32xf32> to vector<32xf32>
    %19 = vector.shape_cast %18 : vector<32xf32> to vector<1x32xf32>
    %cst_18 = arith.constant 1.600000e+01 : f32
    %20 = vector.broadcast %cst_18 : f32 to vector<1x32xf32>
    %21 = arith.divf %19, %20 : vector<1x32xf32>
    %22 = vector.broadcast %21 : vector<1x32xf32> to vector<16x32xf32>
    %23 = arith.subf %15, %22 : vector<16x32xf32>
    %24 = arith.mulf %23, %23 : vector<16x32xf32>
    %cst_19 = arith.constant dense<0.000000e+00> : vector<32xf32>
    %25 = vector.multi_reduction <add>, %24, %cst_19 [0] : vector<16x32xf32> to vector<32xf32>
    %26 = vector.shape_cast %25 : vector<32xf32> to vector<1x32xf32>
    %cst_20 = arith.constant 1.600000e+01 : f32
    %27 = vector.broadcast %cst_20 : f32 to vector<1x32xf32>
    %28 = arith.divf %26, %27 : vector<1x32xf32>
    %cst_21 = arith.constant 9.99999974E-6 : f32
    %29 = vector.broadcast %cst_21 : f32 to vector<1x32xf32>
    %30 = arith.addf %28, %29 : vector<1x32xf32>
    %31 = math.rsqrt %30 : vector<1x32xf32>
    %32 = vector.broadcast %31 : vector<1x32xf32> to vector<16x32xf32>
    %33 = arith.mulf %23, %32 : vector<16x32xf32>
    %34 = vector.broadcast %16 : vector<1x32xf32> to vector<16x32xf32>
    %35 = arith.mulf %33, %34 : vector<16x32xf32>
    %36 = vector.broadcast %17 : vector<1x32xf32> to vector<16x32xf32>
    %37 = arith.addf %35, %36 : vector<16x32xf32>
    %c0_22 = arith.constant 0 : index
    %c0_23 = arith.constant 0 : index
    %38 = vector.load %arg8[%c0_22, %c0_23] : memref<16x32xf32, #tpu.memory_space<vmem>>, vector<16x32xf32>
    tpu.vector_store %arg8[%c0_22, %c0_23], %37 {strides = array<i32>} : memref<16x32xf32, #tpu.memory_space<vmem>>, vector<16x32xf32>,
    return
  }
}

</mosaic_0001>

<bundles_post_ra>
// kernel: gps_encoder_forward.10
= control target key start
LH: loop header
LB: loop body
LE: loop exit
PB: predicated region body
PF: predicated region fallthrough
CT: control target
= control target key end

     0   :  { %vm46_vm0 = vcmask 261120   ;;  %vm145_vm1 = vcmask 523264   ;;  %s457_s2 = inlined_call_operand.vmem [shape: f32[32,64], index: 2, kind: input, shape index: {}]   ;;  %s458_s0 = inlined_call_operand.vmem [shape: f32[16,32], index: 0, kind: input, shape index: {}]   ;;  %s459_s1 = inlined_call_operand.vmem [shape: f32[16,32], index: 1, kind: input, shape index: {}]   ;;  %s460_s4 = inlined_call_operand.vmem [shape: f32[64,32], index: 4, kind: input, shape index: {}]   ;;  %s461_s3 = inlined_call_operand.vmem [shape: f32[1,64], index: 3, kind: input, shape index: {}]   ;;  %s462_s5 = inlined_call_operand.vmem [shape: f32[1,32], index: 5, kind: input, shape index: {}]   ;;  %s463_s6 = inlined_call_operand.vmem [shape: f32[1,32], index: 6, kind: input, shape index: {}]   ;;  %s464_s7 = inlined_call_operand.vmem [shape: f32[1,32], index: 7, kind: input, shape index: {}]   ;;  %s465_s8 = inlined_call_operand.vmem [shape: f32[16,32], index: 8, kind: output, shape index: {}]  }
   0x1   :  { %v38_v0 = vld [vmem:[%s457_s2 + $0x18] sm:$0xff]  ;;  %v37_v1 = vld [vmem:[%s457_s2 + $0x10] sm:$0xff]  ;;  %v36_v2 = vld [vmem:[%s457_s2 + $0x8] sm:$0xff] }
   0x2   :  { %306 = vmatprep.subr.mxu0 %v38_v0  ;;  %v29_v3 = vld [vmem:[%s458_s0] sm:$0xff]  ;;  %v30_v4 = vld [vmem:[%s458_s0 + $0x8] sm:$0xff]  ;;  %v137_v7 = vld [vmem:[%s460_s4 + $0x38] sm:$0xff] }
   0x3   :  { %307 = vmatpush3.msra.mxu0 %v38_v0  ;;  %v31_v5 = vld [vmem:[%s459_s1] sm:$0xff]  ;;  %v32_v6 = vld [vmem:[%s459_s1 + $0x8] sm:$0xff]  ;;  %317 = vmatprep.subr.mxu1 %v137_v7  ;;  %v136_v9 = vld [vmem:[%s460_s4 + $0x30] sm:$0xff] }
   0x4   :  { %308 = vmatprep.subr.mxu0 %v37_v1  ;;  %v33_v8 = vadd.f32 %v31_v5, %v29_v3  ;;  %v35_v10 = vld [vmem:[%s457_s2] sm:$0xff]  ;;  %318 = vmatpush3.msra.mxu1 %v137_v7  ;;  %v34_v11 = vadd.f32 %v32_v6, %v30_v4  ;;  %v135_v12 = vld [vmem:[%s460_s4 + $0x28] sm:$0xff]  ;;  %v133_v14 = vld [vmem:[%s460_s4 + $0x18] sm:$0xff] }
   0x5   :  { %309 = vmatpush3.msra.mxu0 %v37_v1  ;;  %319 = vmatprep.subr.mxu1 %v136_v9  ;;  %v134_v13 = vld [vmem:[%s460_s4 + $0x20] sm:$0xff]  ;;  %v132_v15 = vld [vmem:[%s460_s4 + $0x10] sm:$0xff]  ;;  %v131_v16 = vld [vmem:[%s460_s4 + $0x8] sm:$0xff] }
   0x6   :  { %310 = vmatprep.subr.mxu0 %v36_v2  ;;  %314 = vmatprep.mubr.msk.f32.mxu0 %vm46_vm0, %v33_v8  ;;  %v130_v17 = vld [vmem:[%s460_s4] sm:$0xff] }
   0x7   :  { %311 = vmatpush3.msra.mxu0 %v36_v2  ;;  %320 = vmatpush3.msra.mxu1 %v136_v9  ;;  %v282_v18 = vld [vmem:[%s461_s3] ss:$0 sm:$0xff] }
   0x8   :  { %312 = vmatprep.subr.mxu0 %v35_v10  ;;  %321 = vmatprep.subr.mxu1 %v135_v12  ;;  %v285_v25 = vld [vmem:[%s462_s5] ss:$0 sm:$0xff] }
   0x9   :  { %313 = vmatpush3.msra.mxu0 %v35_v10  ;;  %322 = vmatpush3.msra.mxu1 %v135_v12  ;;  %v288_v58 = vld [vmem:[%s463_s6] ss:$0 sm:$0xff] }
   0xa   :  { %315 = vmatmul.mubr.msk.f32.vlgmr.msra.gmra.mxu0 %vm46_vm0, %v34_v11  ;;  %323 = vmatprep.subr.mxu1 %v134_v13  ;;  %v289_v61 = vld [vmem:[%s464_s7] ss:$0 sm:$0xff] }
   0xb   :  { %324 = vmatpush3.msra.mxu1 %v134_v13 }
   0xc   :  { %325 = vmatprep.subr.mxu1 %v133_v14 }
   0xd   :  { %326 = vmatpush3.msra.mxu1 %v133_v14 }
   0xe   :  { %327 = vmatprep.subr.mxu1 %v132_v15 }
   0xf   :  { %328 = vmatpush3.msra.mxu1 %v132_v15 }
  0x10   :  { %329 = vmatprep.subr.mxu1 %v131_v16 }
  0x11   :  { %330 = vmatpush3.msra.mxu1 %v131_v16 }
  0x12   :  { %331 = vmatprep.subr.mxu1 %v130_v17 }
  0x13   :  { %332 = vmatpush3.msra.mxu1 %v130_v17 }
  0xca   :  { %v316_v19 = vpop.f32.mrf.mxu0 }
  0xcb   :  { %v125_v20 = vadd.f32 %v316_v19, %v282_v18 }
  0xcc   :  { %v119_v21 = vpop.f32.mrf.mxu0 }
  0xcd   :  { %v120_v22 = vadd.f32 %v282_v18, %v119_v21  ;;  %v129_v24 = vmax.f32 %v125_v20, 0.0 }
  0xcf   :  { %v128_v23 = vmax.f32 %v120_v22, 0.0 }
  0xd1   :  { %333 = vmatprep.mubr.msk.f32.mxu1 %vm145_vm1, %v128_v23 }
  0xd2   :  { %334 = vmatmul.mubr.msk.f32.vlgmr.msra.gmra.mxu1 %vm145_vm1, %v129_v24 }
 0x192   :  { %v335_v26 = vpop.f32.mrf.mxu1 }
 0x193   :  { %v224_v27 = vadd.f32 %v335_v26, %v285_v25 }
 0x194   :  { %v218_v28 = vpop.f32.mrf.mxu1 }
 0x195   :  { %v228_v29 = vadd.f32 %v224_v27, %v34_v11  ;;  %v219_v30 = vadd.f32 %v285_v25, %v218_v28 }
 0x197   :  { %v227_v31 = vadd.f32 %v219_v30, %v33_v8  ;;  %v232_v32 = vsel %vm46_vm0, %v228_v29, 0.0 }
 0x199   :  { %v231_v33 = vsel %vm46_vm0, %v227_v31, 0.0 }
 0x19a   :  { %v233_v34 = vadd.f32 %v232_v32, %v231_v33 }
 0x19c   :  { %v234_v35 = vrot.slane %v233_v34, 4 }
 0x19e   :  { %v235_v36 = vadd.f32 %v234_v35, %v233_v34 }
 0x1a0   :  { %v236_v37 = vrot.slane %v235_v36, 2 }
 0x1a2   :  { %v237_v38 = vadd.f32 %v236_v37, %v235_v36 }
 0x1a4   :  { %v238_v39 = vrot.slane %v237_v38, 1 }
 0x1a6   :  { %v239_v40 = vadd.f32 %v238_v39, %v237_v38 }
 0x1a8   :  { %v241_v41 = vmul.f32 0.0625, %v239_v40 }
 0x1aa   :  { %v242_v42 = vsub.f32 %v227_v31, %v241_v41  ;;  %v243_v43 = vsub.f32 %v228_v29, %v241_v41 }
 0x1ac   :  { %v244_v44 = vmul.f32 %v242_v42, %v242_v42  ;;  %v245_v45 = vmul.f32 %v243_v43, %v243_v43 }
 0x1ae   :  { %v246_v46 = vsel %vm46_vm0, %v244_v44, 0.0  ;;  %v247_v47 = vsel %vm46_vm0, %v245_v45, 0.0 }
 0x1af   :  { %v248_v48 = vadd.f32 %v247_v47, %v246_v46 }
 0x1b1   :  { %v249_v49 = vrot.slane %v248_v48, 4 }
 0x1b3   :  { %v250_v50 = vadd.f32 %v249_v49, %v248_v48 }
 0x1b5   :  { %v251_v51 = vrot.slane %v250_v50, 2 }
 0x1b7   :  { %v252_v52 = vadd.f32 %v251_v51, %v250_v50 }
 0x1b9   :  { %v253_v53 = vrot.slane %v252_v52, 1 }
 0x1bb   :  { %v254_v54 = vadd.f32 %v253_v53, %v252_v52 }
 0x1bd   :  { %v255_v55 = vmul.f32 0.0625, %v254_v54 }
 0x1bf   :  { %v256_v56 = vadd.f32 1e-05, %v255_v55 }
 0x1c1   :  { %336 = vrsqrt.f32 %v256_v56 }
 0x1ce   :  { %v337_v57 = vpop.eup %336 }
 0x1cf   :  { %v258_v59 = vmul.f32 %v337_v57, %v242_v42  ;;  %v259_v60 = vmul.f32 %v337_v57, %v243_v43 }
 0x1d1   :  { %v266_v62 = vmul.f32 %v288_v58, %v258_v59  ;;  %v267_v63 = vmul.f32 %v288_v58, %v259_v60 }
 0x1d3   :  { %v274_v0 = vadd.f32 %v289_v61, %v266_v62  ;;  %v275_v1 = vadd.f32 %v289_v61, %v267_v63 }
 0x1d5   :  { %276 = vst.msk [vmem:[%s465_s8] sm:$0xff] %vm46_vm0, %v274_v0  ;;  %277 = vst.msk [vmem:[%s465_s8 + $0x8] sm:$0xff] %vm46_vm0, %v275_v1 }

// kernel: gps_encoder_forward.7
= control target key start
LH: loop header
LB: loop body
LE: loop exit
PB: predicated region body
PF: predicated region fallthrough
CT: control target
= control target key end

     0   :  { %vm44_vm0 = vcmask 64512   ;;  %vm249_vm1 = vcmask 1045504   ;;  %vm236_vm2 = vcmask 48128   ;;  %vm221_vm3 = vcmask 261120   ;;  %s522_s3 = inlined_call_operand.vmem [shape: f32[8,32], index: 3, kind: input, shape index: {}]   ;;  %s523_s0 = inlined_call_operand.vmem [shape: f32[16,8], index: 0, kind: input, shape index: {}]   ;;  %s524_s7 = inlined_call_operand.vmem [shape: f32[6,32], index: 7, kind: input, shape index: {}]   ;;  %s525_s5 = inlined_call_operand.vmem [shape: f32[8,32], index: 5, kind: input, shape index: {}]   ;;  %s526_s2 = inlined_call_operand.vmem [shape: f32[32,6], index: 2, kind: input, shape index: {}]   ;;  %s527_s1 = inlined_call_operand.vmem [shape: f32[16,8], index: 1, kind: input, shape index: {}]   ;;  %s528_s4 = inlined_call_operand.vmem [shape: f32[1,32], index: 4, kind: input, shape index: {}]   ;;  %s529_s8 = inlined_call_operand.vmem [shape: f32[1,32], index: 8, kind: input, shape index: {}]   ;;  %s530_s6 = inlined_call_operand.vmem [shape: f32[1,32], index: 6, kind: input, shape index: {}]   ;;  %s531_s10 = inlined_call_operand.vmem [shape: f32[32,32], index: 10, kind: output, shape index: {1}]   ;;  %s532_s9 = inlined_call_operand.vmem [shape: f32[16,32], index: 9, kind: output, shape index: {0}]  }
   0x1   :  { %v36_v0 = vld [vmem:[%s522_s3] sm:$0xff]  ;;  %v35_v2 = vld [vmem:[%s523_s0 + $0x8] sm:$0xff]  ;;  %v226_v8 = vld [vmem:[%s526_s2 + $0x10] sm:$0xff] }
   0x2   :  { %v34_v1 = vld [vmem:[%s523_s0] sm:$0xff]  ;;  %373 = vmatprep.subr.mxu1 %v36_v0  ;;  %v225_v6 = vld [vmem:[%s526_s2 + $0x8] sm:$0xff]  ;;  %v227_v10 = vld [vmem:[%s526_s2 + $0x18] sm:$0xff] }
   0x3   :  { %375 = vmatprep.mubr.msk.f32.mxu1 %vm44_vm0, %v34_v1  ;;  %v228_v3 = vld [vmem:[%s524_s7] sm:$0x3f]  ;;  %374 = vmatpush3.msra.mxu1 %v36_v0  ;;  %v127_v9 = vld [vmem:[%s527_s1 + $0x8] sm:$0xff] }
   0x4   :  { %v128_v4 = vld [vmem:[%s525_s5] sm:$0xff]  ;;  %383 = vmatprep.subr.msk.mxu0 %vm249_vm1, %v228_v3  ;;  %376 = vmatmul.mubr.msk.f32.vlgmr.msra.gmra.mxu1 %vm44_vm0, %v35_v2 }
   0x5   :  { %v224_v5 = vld [vmem:[%s526_s2] sm:$0xff]  ;;  %378 = vmatprep.subr.mxu1 %v128_v4  ;;  %384 = vmatpush3.msk.msra.mxu0 %vm249_vm1, %v228_v3 }
   0x6   :  { %v126_v7 = vld [vmem:[%s527_s1] sm:$0xff]  ;;  %385 = vmatprep.mubr.msk.f32.mxu0 %vm236_vm2, %v224_v5  ;;  %379 = vmatpush3.msra.mxu1 %v128_v4 }
   0x7   :  { %386 = vmatmul.mubr.msk.f32.vlgmr.msra.gmra.mxu0 %vm236_vm2, %v225_v6  ;;  %380 = vmatprep.mubr.msk.f32.mxu1 %vm44_vm0, %v126_v7  ;;  %v350_v12 = vld [vmem:[%s528_s4] ss:$0 sm:$0xff] }
   0x8   :  { %388 = vmatprep.mubr.msk.f32.mxu0 %vm236_vm2, %v226_v8  ;;  %381 = vmatmul.mubr.msk.f32.vlgmr.msra.gmra.mxu1 %vm44_vm0, %v127_v9  ;;  %v356_v13 = vld [vmem:[%s529_s8] ss:$0 sm:$0xff] }
   0x9   :  { %v355_v20 = vld [vmem:[%s530_s6] ss:$0 sm:$0xff] }
   0xb   :  { %389 = vmatmul.mubr.msk.f32.gmra.mxu0 %vm236_vm2, %v227_v10 }
  0xc4   :  { %v377_v11 = vpop.f32.mrf.mxu1 }
  0xc5   :  { %v123_v16 = vadd.f32 %v377_v11, %v350_v12 }
  0xc6   :  { %v117_v15 = vpop.f32.mrf.mxu1 }
  0xc7   :  { %v387_v14 = vpop.f32.mrf.mxu0  ;;  %v118_v21 = vadd.f32 %v350_v12, %v117_v15 }
  0xc8   :  { %v325_v17 = vadd.f32 %v387_v14, %v356_v13  ;;  %v382_v19 = vpop.f32.mrf.mxu1 }
  0xc9   :  { %v319_v18 = vpop.f32.mrf.mxu0  ;;  %v211_v23 = vadd.f32 %v382_v19, %v123_v16 }
  0xca   :  { %339 = vst.msk [vmem:[%s531_s10 + $0x8] sm:$0xff] %vm221_vm3, %v325_v17  ;;  %v320_v22 = vadd.f32 %v356_v13, %v319_v18  ;;  %v201_v25 = vpop.f32.mrf.mxu1 }
  0xcb   :  { %v390_v24 = vpop.f32.mrf.mxu0  ;;  %v220_v26 = vadd.f32 %v355_v20, %v211_v23  ;;  %v210_v28 = vadd.f32 %v201_v25, %v118_v21 }
  0xcc   :  { %338 = vst.msk [vmem:[%s531_s10] sm:$0xff] %vm221_vm3, %v320_v22  ;;  %v335_v27 = vadd.f32 %v390_v24, %v356_v13 }
  0xcd   :  { %v329_v29 = vpop.f32.mrf.mxu0  ;;  %223 = vst.msk [vmem:[%s532_s9 + $0x8] sm:$0xff] %vm221_vm3, %v220_v26  ;;  %v219_v30 = vadd.f32 %v355_v20, %v210_v28 }
  0xce   :  { %341 = vst.msk [vmem:[%s531_s10 + $0x18] sm:$0xff] %vm221_vm3, %v335_v27  ;;  %v330_v31 = vadd.f32 %v356_v13, %v329_v29 }
  0xcf   :  { %222 = vst.msk [vmem:[%s532_s9] sm:$0xff] %vm221_vm3, %v219_v30 }
  0xd0   :  { %340 = vst.msk [vmem:[%s531_s10 + $0x10] sm:$0xff] %vm221_vm3, %v330_v31 }

// kernel: gps_encoder_forward.8
= control target key start
LH: loop header
LB: loop body
LE: loop exit
PB: predicated region body
PF: predicated region fallthrough
CT: control target
= control target key end

     0   :  { %v615_v0 = vmov 0   ;;  %v41_v7 = vlaneseq  ;;  %vm89_vm0 = vcmask 130048   ;;  %v616_v11 = vmov 0.0   ;;  %s780_s3 = inlined_call_operand.vmem [shape: s32[32,1], index: 3, kind: input, shape index: {}]   ;;  %s781_s1 = inlined_call_operand.vmem [shape: f32[16,32], index: 1, kind: input, shape index: {}]   ;;  %s782_s4 = inlined_call_operand.vmem [shape: s32[1,32], index: 4, kind: input, shape index: {}]   ;;  %s783_s5 = inlined_call_operand.vmem [shape: f32[32,32], index: 5, kind: input, shape index: {}]   ;;  %s784_s2 = inlined_call_operand.vmem [shape: f32[32,32], index: 2, kind: input, shape index: {}]   ;;  %s785_s0 = inlined_call_operand.<no memory space> [shape: f32[1,1], index: 0, kind: input, shape index: {}]   ;;  %s786_s7 = inlined_call_operand.vmem [shape: f32[32,32], index: 7, kind: input, shape index: {}]   ;;  %s787_s6 = inlined_call_operand.vmem [shape: f32[1,32], index: 6, kind: input, shape index: {}]   ;;  %s788_s8 = inlined_call_operand.vmem [shape: f32[1,32], index: 8, kind: input, shape index: {}]   ;;  %s789_s9 = inlined_call_operand.vmem [shape: f32[1,32], index: 9, kind: input, shape index: {}]   ;;  %s790_s10 = inlined_call_operand.vmem [shape: f32[1,32], index: 10, kind: input, shape index: {}]   ;;  %s791_s11 = inlined_call_operand.vmem [shape: f32[16,32], index: 11, kind: output, shape index: {}]  }
   0x1   :  { %612 = vset.pattern.permute.xlu1 %v615_v0  ;;  %611 = vset.pattern.permute.xlu0 %v615_v0  ;;  %v45_v1 = vld [vmem:[%s780_s3 + $0x10] sm:$0xff]  ;;  %v43_v2 = vld [vmem:[%s780_s3] sm:$0xff]  ;;  %v686_v3 = vld [vmem:[%s781_s1 + $0x8] sm:$0xff]  ;;  %vm191_vm7 = vcmask 261120   ;;  %s274_s26 = sadd.f32 1.0, %s785_s0 }
   0x2   :  { %54 = vperm.xlu1 %612, %v45_v1   ;;  %48 = vperm.xlu0 %611, %v43_v2   ;;  %v691_v4 = vld [vmem:[%s781_s1] sm:$0xff]  ;;  %v46_v5 = vld [vmem:[%s780_s3 + $0x18] sm:$0xff]  ;;  %v44_v6 = vld [vmem:[%s780_s3 + $0x8] sm:$0xff]  ;;  %v42_v8 = vand.u32 127, %v41_v7  ;;  %v72_v18 = vshrl.u32 %v41_v7, 7 }
   0x3   :  { %566 = vmatprep.subr.mxu0 %v686_v3  ;;  %v525_v20 = vld [vmem:[%s782_s4] ss:$0 sm:$0xff]  ;;  %v283_v22 = vld [vmem:[%s783_s5 + $0x18] sm:$0xff]  ;;  %v282_v23 = vld [vmem:[%s783_s5 + $0x10] sm:$0xff]  ;;  %v275_v43 = vstv %s274_s26 }
   0x4   :  { %567 = vmatpush3.msra.mxu0 %v686_v3  ;;  %v73_v19 = vadd.s32 8, %v72_v18  ;;  %vm79_vm5 = vcmp.eq.s32.totalorder %v525_v20, %v72_v18  ;;  %v88_v26 = vld [vmem:[%s784_s2 + $0x18] sm:$0xff]  ;;  %v86_v27 = vld [vmem:[%s784_s2 + $0x8] sm:$0xff]  ;;  %v87_v29 = vld [vmem:[%s784_s2 + $0x10] sm:$0xff]  ;;  %v276_v44 = vmul.f32 %v275_v43, %v691_v4  ;;  %v277_v46 = vmul.f32 %v275_v43, %v686_v3 }
   0x5   :  { %568 = vmatprep.subr.mxu0 %v691_v4  ;;  %v526_v21 = vsel %vm79_vm5, 1.0, %v616_v11  ;;  %v85_v31 = vld [vmem:[%s784_s2] sm:$0xff]  ;;  %v281_v41 = vld [vmem:[%s783_s5 + $0x8] sm:$0xff]  ;;  %v377_v50 = vld [vmem:[%s786_s7 + $0x18] sm:$0xff] }
   0x6   :  { %57 = vperm.xlu1 %612, %v46_v5   ;;  %51 = vperm.xlu0 %611, %v44_v6   ;;  %vm80_vm6 = vcmp.eq.s32.totalorder %v525_v20, %v73_v19  ;;  %v280_v42 = vld [vmem:[%s783_s5] sm:$0xff]  ;;  %v376_v51 = vld [vmem:[%s786_s7 + $0x10] sm:$0xff]  ;;  %v375_v52 = vld [vmem:[%s786_s7 + $0x8] sm:$0xff] }
   0x7   :  { %569 = vmatpush3.msra.mxu0 %v691_v4  ;;  %584 = vmatprep.mubr.msk.f32.mxu1 %vm191_vm7, %v526_v21  ;;  %v527_v40 = vsel %vm80_vm6, 1.0, %v616_v11  ;;  %v374_v53 = vld [vmem:[%s786_s7] sm:$0xff] }
   0x8   :  { %587 = vmatprep.subr.mxu0 %v283_v22  ;;  %v534_v54 = vld [vmem:[%s787_s6] ss:$0 sm:$0xff] }
   0x9   :  { %v537_v61 = vld [vmem:[%s788_s8] ss:$0 sm:$0xff] }
  0x7d   :  { %v55_v9 = vpop.permute.xlu1 %54  ;;  %v49_v10 = vpop.permute.xlu0 %48 }
  0x7e   :  { %vm59_vm1 = vcmp.eq.s32.totalorder %v49_v10, %v42_v8  ;;  %vm61_vm2 = vcmp.eq.s32.totalorder %v55_v9, %v42_v8 }
  0x7f   :  { %v521_v12 = vsel %vm59_vm1, 1.0, %v616_v11  ;;  %v523_v15 = vsel %vm61_vm2, 1.0, %v616_v11 }
  0x80   :  { %570 = vmatprep.mubr.msk.f32.mxu0 %vm89_vm0, %v521_v12 }
  0x81   :  { %v58_v13 = vpop.permute.xlu1 %57  ;;  %v52_v14 = vpop.permute.xlu0 %51 }
  0x82   :  { %vm60_vm3 = vcmp.eq.s32.totalorder %v52_v14, %v42_v8  ;;  %vm62_vm4 = vcmp.eq.s32.totalorder %v58_v13, %v42_v8 }
  0x83   :  { %v522_v16 = vsel %vm60_vm3, 1.0, %v616_v11  ;;  %v524_v17 = vsel %vm62_vm4, 1.0, %v616_v11 }
  0x84   :  { %571 = vmatmul.mubr.msk.f32.vlgmr.msra.gmra.mxu0 %vm89_vm0, %v522_v16 }
  0x85   :  { %573 = vmatprep.mubr.msk.f32.mxu0 %vm89_vm0, %v523_v15  ;;  %588 = vmatpush3.msra.mxu0 %v283_v22 }
  0x86   :  { %589 = vmatprep.subr.mxu0 %v282_v23 }
  0x87   :  { %590 = vmatpush3.msra.mxu0 %v282_v23 }
  0x88   :  { %574 = vmatmul.mubr.msk.f32.gmra.mxu0 %vm89_vm0, %v524_v17  ;;  %591 = vmatprep.subr.mxu0 %v281_v41 }
  0x89   :  { %592 = vmatpush3.msra.mxu0 %v281_v41 }
  0x8a   :  { %593 = vmatprep.subr.mxu0 %v280_v42 }
  0x8b   :  { %594 = vmatpush3.msra.mxu0 %v280_v42 }
 0x144   :  { %v572_v24 = vpop.f32.mrf.mxu0 }
 0x145   :  { %v174_v33 = vadd.f32 %v572_v24, %v86_v27 }
 0x146   :  { %v168_v25 = vpop.f32.mrf.mxu0 }
 0x147   :  { %v169_v36 = vadd.f32 %v168_v25, %v85_v31  ;;  %v188_v38 = vmax.f32 %v174_v33, 0.0  ;;  %v541_v33 = vld [vmem:[%s790_s10] ss:$0 sm:$0xff] }
 0x148   :  { %v575_v28 = vpop.f32.mrf.mxu0 }
 0x149   :  { %v184_v30 = vadd.f32 %v575_v28, %v88_v26  ;;  %v187_v39 = vmax.f32 %v169_v36, 0.0 }
 0x14a   :  { %v178_v32 = vpop.f32.mrf.mxu0 }
 0x14b   :  { %v190_v34 = vmax.f32 %v184_v30, 0.0  ;;  %v179_v35 = vadd.f32 %v178_v32, %v87_v29  ;;  %v540_v30 = vld [vmem:[%s789_s9] ss:$0 sm:$0xff] }
 0x14d   :  { %v189_v37 = vmax.f32 %v179_v35, 0.0  ;;  %576 = vmatprep.subr.mxu1 %v190_v34 }
 0x14e   :  { %577 = vmatpush3.msra.mxu1 %v190_v34 }
 0x14f   :  { %578 = vmatprep.subr.mxu1 %v189_v37 }
 0x150   :  { %579 = vmatpush3.msra.mxu1 %v189_v37 }
 0x151   :  { %580 = vmatprep.subr.mxu1 %v188_v38 }
 0x152   :  { %581 = vmatpush3.msra.mxu1 %v188_v38 }
 0x153   :  { %582 = vmatprep.subr.mxu1 %v187_v39 }
 0x154   :  { %583 = vmatpush3.msra.mxu1 %v187_v39 }
 0x155   :  { %585 = vmatmul.mubr.msk.f32.vlgmr.msra.gmra.mxu1 %vm191_vm7, %v527_v40  ;;  %598 = vmatprep.subr.mxu1 %v377_v50 }
 0x156   :  { %599 = vmatpush3.msra.mxu1 %v377_v50 }
 0x157   :  { %600 = vmatprep.subr.mxu1 %v376_v51 }
 0x158   :  { %601 = vmatpush3.msra.mxu1 %v376_v51 }
 0x159   :  { %602 = vmatprep.subr.mxu1 %v375_v52 }
 0x15a   :  { %603 = vmatpush3.msra.mxu1 %v375_v52 }
 0x15b   :  { %604 = vmatprep.subr.mxu1 %v374_v53 }
 0x15c   :  { %605 = vmatpush3.msra.mxu1 %v374_v53 }
 0x215   :  { %v586_v45 = vpop.f32.mrf.mxu1 }
 0x216   :  { %v279_v49 = vadd.f32 %v586_v45, %v277_v46 }
 0x217   :  { %v264_v47 = vpop.f32.mrf.mxu1 }
 0x218   :  { %v278_v48 = vadd.f32 %v276_v44, %v264_v47 }
 0x21a   :  { %595 = vmatprep.mubr.msk.f32.mxu0 %vm191_vm7, %v278_v48 }
 0x21b   :  { %596 = vmatmul.mubr.msk.f32.vlgmr.msra.gmra.mxu0 %vm191_vm7, %v279_v49 }
 0x2db   :  { %v597_v55 = vpop.f32.mrf.mxu0 }
 0x2dc   :  { %v369_v56 = vadd.f32 %v597_v55, %v534_v54 }
 0x2dd   :  { %v363_v57 = vpop.f32.mrf.mxu0 }
 0x2de   :  { %v364_v58 = vadd.f32 %v534_v54, %v363_v57  ;;  %v373_v60 = vmax.f32 %v369_v56, 0.0 }
 0x2e0   :  { %v372_v59 = vmax.f32 %v364_v58, 0.0 }
 0x2e2   :  { %606 = vmatprep.mubr.msk.f32.mxu1 %vm191_vm7, %v372_v59 }
 0x2e3   :  { %607 = vmatmul.mubr.msk.f32.vlgmr.msra.gmra.mxu1 %vm191_vm7, %v373_v60 }
 0x3a3   :  { %v608_v62 = vpop.f32.mrf.mxu1 }
 0x3a4   :  { %v463_v63 = vadd.f32 %v608_v62, %v537_v61 }
 0x3a5   :  { %v457_v0 = vpop.f32.mrf.mxu1 }
 0x3a6   :  { %v467_v1 = vadd.f32 %v463_v63, %v686_v3  ;;  %v458_v2 = vadd.f32 %v537_v61, %v457_v0 }
 0x3a8   :  { %v466_v5 = vadd.f32 %v458_v2, %v691_v4  ;;  %v471_v6 = vsel %vm191_vm7, %v467_v1, 0.0 }
 0x3aa   :  { %v470_v7 = vsel %vm191_vm7, %v466_v5, 0.0 }
 0x3ab   :  { %v472_v8 = vadd.f32 %v471_v6, %v470_v7 }
 0x3ad   :  { %v473_v9 = vrot.slane %v472_v8, 4 }
 0x3af   :  { %v474_v10 = vadd.f32 %v473_v9, %v472_v8 }
 0x3b1   :  { %v475_v11 = vrot.slane %v474_v10, 2 }
 0x3b3   :  { %v476_v12 = vadd.f32 %v475_v11, %v474_v10 }
 0x3b5   :  { %v477_v13 = vrot.slane %v476_v12, 1 }
 0x3b7   :  { %v478_v14 = vadd.f32 %v477_v13, %v476_v12 }
 0x3b9   :  { %v480_v15 = vmul.f32 0.0625, %v478_v14 }
 0x3bb   :  { %v481_v16 = vsub.f32 %v466_v5, %v480_v15  ;;  %v482_v17 = vsub.f32 %v467_v1, %v480_v15 }
 0x3bd   :  { %v483_v18 = vmul.f32 %v481_v16, %v481_v16  ;;  %v484_v19 = vmul.f32 %v482_v17, %v482_v17 }
 0x3bf   :  { %v485_v3 = vsel %vm191_vm7, %v483_v18, 0.0  ;;  %v486_v4 = vsel %vm191_vm7, %v484_v19, 0.0 }
 0x3c0   :  { %v487_v20 = vadd.f32 %v486_v4, %v485_v3 }
 0x3c2   :  { %v488_v21 = vrot.slane %v487_v20, 4 }
 0x3c4   :  { %v489_v22 = vadd.f32 %v488_v21, %v487_v20 }
 0x3c6   :  { %v490_v23 = vrot.slane %v489_v22, 2 }
 0x3c8   :  { %v491_v24 = vadd.f32 %v490_v23, %v489_v22 }
 0x3ca   :  { %v492_v25 = vrot.slane %v491_v24, 1 }
 0x3cc   :  { %v493_v26 = vadd.f32 %v492_v25, %v491_v24 }
 0x3ce   :  { %v494_v27 = vmul.f32 0.0625, %v493_v26 }
 0x3d0   :  { %v495_v28 = vadd.f32 1e-05, %v494_v27 }
 0x3d2   :  { %613 = vrsqrt.f32 %v495_v28 }
 0x3df   :  { %v614_v29 = vpop.eup %613 }
 0x3e0   :  { %v497_v31 = vmul.f32 %v614_v29, %v481_v16  ;;  %v498_v32 = vmul.f32 %v614_v29, %v482_v17 }
 0x3e2   :  { %v505_v34 = vmul.f32 %v540_v30, %v497_v31  ;;  %v506_v35 = vmul.f32 %v540_v30, %v498_v32 }
 0x3e4   :  { %v513_v36 = vadd.f32 %v541_v33, %v505_v34  ;;  %v514_v37 = vadd.f32 %v541_v33, %v506_v35 }
 0x3e6   :  { %515 = vst.msk [vmem:[%s791_s11] sm:$0xff] %vm191_vm7, %v513_v36  ;;  %516 = vst.msk [vmem:[%s791_s11 + $0x8] sm:$0xff] %vm191_vm7, %v514_v37 }

// kernel: gps_encoder_forward.9
= control target key start
LH: loop header
LB: loop body
LE: loop exit
PB: predicated region body
PF: predicated region fallthrough
CT: control target
= control target key end

     0   :  { %vm45_vm0 = vcmask 261120   ;;  %v1342_v7 = vmov 0   ;;  %vm148_vm1 = vcmask 64512   ;;  %vm236_vm2 = vcmask 130048   ;;  %s1345_s26 = smov 88   ;;  %s1346_s27 = smov 120   ;;  %s1608_s3 = inlined_call_operand.vmem [shape: f32[32,96], index: 3, kind: input, shape index: {}]   ;;  %s1609_s0 = inlined_call_operand.vmem [shape: f32[16,32], index: 0, kind: input, shape index: {}]   ;;  %s1610_s4 = inlined_call_operand.vmem [shape: f32[1,96], index: 4, kind: input, shape index: {}]   ;;  %s1611_s1 = inlined_call_operand.vmem [shape: s32[16,1], index: 1, kind: input, shape index: {}]   ;;  %s1612_s2 = inlined_call_operand.vmem [shape: s32[1,16], index: 2, kind: input, shape index: {}]   ;;  %s1613_s5 = inlined_call_operand.vmem [shape: f32[32,32], index: 5, kind: input, shape index: {}]   ;;  %s1614_s6 = inlined_call_operand.vmem [shape: f32[1,32], index: 6, kind: input, shape index: {}]   ;;  %s1615_s7 = inlined_call_operand.vmem [shape: f32[1,32], index: 7, kind: input, shape index: {}]   ;;  %s1616_s8 = inlined_call_operand.vmem [shape: f32[1,32], index: 8, kind: input, shape index: {}]   ;;  %s1617_s9 = inlined_call_operand.vmem [shape: f32[16,32], index: 9, kind: output, shape index: {}]  }
   0x1   :  { %v37_v0 = vld [vmem:[%s1608_s3 + $0x18] sm:$0xff]  ;;  %v36_v1 = vld [vmem:[%s1608_s3 + $0x10] sm:$0xff]  ;;  %v1416_v2 = vld [vmem:[%s1609_s0] sm:$0xff]  ;;  %1306 = vset.pattern.permute.xlu1 %v1342_v7  ;;  %1307 = vset.pattern.permute.xlu0 %v1342_v7  ;;  %s1347_s28 = smov 56   ;;  %s1348_s29 = smov 80   ;;  %vm986_vm5 = vcmask 195584  }
   0x2   :  { %1213 = vmatprep.subr.mxu0 %v37_v0  ;;  %v35_v3 = vld [vmem:[%s1608_s3 + $0x8] sm:$0xff]  ;;  %1221 = vmatprep.mubr.msk.f32.mxu0 %vm45_vm0, %v1416_v2  ;;  %v34_v4 = vld [vmem:[%s1608_s3] sm:$0xff]  ;;  %s1349_s30 = smov 112   ;;  %s1350_s10 = smov 48  }
   0x3   :  { %1214 = vmatpush3.msra.mxu0 %v37_v0  ;;  %v1429_v5 = vld [vmem:[%s1609_s0 + $0x8] sm:$0xff]  ;;  %v1136_v6 = vld [vmem:[%s1610_s4] ss:$0 sm:$0xff]  ;;  %s1343_s4 = smov 96   ;;  %s1351_s11 = smov 72  }
   0x4   :  { %1215 = vmatprep.subr.mxu0 %v36_v1  ;;  %v127_v8 = vld [vmem:[%s1611_s1] sm:$0xff]  ;;  %v128_v11 = vld [vmem:[%s1611_s1 + $0x8] sm:$0xff]  ;;  %s1352_s12 = smov 104   ;;  %s1353_s13 = smov 40  }
   0x5   :  { %1216 = vmatpush3.msra.mxu0 %v36_v1  ;;  %131 = vperm.xlu1 %1306, %v127_v8   ;;  %v1461_v17 = vld [vmem:[%s1612_s2] ss:$0 sm:$0xff]  ;;  %s1344_s2 = smov 64   ;;  %s1354_s14 = smov 8  }
   0x6   :  { %1217 = vmatprep.subr.mxu0 %v35_v3  ;;  %s1355_s15 = smov 16   ;;  %s1356_s3 = smov 24  }
   0x7   :  { %1218 = vmatpush3.msra.mxu0 %v35_v3 }
   0x8   :  { %1219 = vmatprep.subr.mxu0 %v34_v4 }
   0x9   :  { %1220 = vmatpush3.msra.mxu0 %v34_v4  ;;  %134 = vperm.xlu1 %1306, %v128_v11  }
   0xa   :  { %1222 = vmatmul.mubr.msk.f32.vlgmr.msra.gmra.mxu0 %vm45_vm0, %v1429_v5 }
  0x80   :  { %v1456_v16 = vpop.permute.xlu1 %131 }
  0x81   :  { %vm140_vm4 = vcmp.eq.s32.totalorder %v1456_v16, %v1461_v17 }
  0x84   :  { %v1463_v18 = vpop.permute.xlu1 %134 }
  0x85   :  { %vm141_vm3 = vcmp.eq.s32.totalorder %v1463_v18, %v1461_v17 }
  0xca   :  { %v1223_v9 = vpop.f32.mrf.mxu0 }
  0xcb   :  { %v1439_v10 = vadd.f32 %v1223_v9, %v1136_v6 }
  0xcc   :  { %v118_v12 = vpop.f32.mrf.mxu0 }
  0xcd   :  { %v1444_v13 = vadd.f32 %v1136_v6, %v118_v12  ;;  %146 = vrot.lane.b32.xlu0 %v1439_v10, %s1343_s4 }
  0xcf   :  { %1228 = vmatprep.mubr.msk.f32.mxu1 %vm148_vm1, %v1444_v13 }
  0xd1   :  { %144 = vrot.lane.b32.xlu0 %v1444_v13, %s1343_s4 }
 0x13f   :  { %v147_v14 = vpop.permute.xlu0 %146 }
 0x140   :  { %1224 = vmatprep.subr.msk.mxu1 %vm148_vm1, %v147_v14 }
 0x141   :  { %1225 = vmatpush3.xpose.msk.msra.mxu1 %vm148_vm1, %v147_v14 }
 0x143   :  { %v145_v15 = vpop.permute.xlu0 %144 }
 0x144   :  { %1226 = vmatprep.subr.msk.mxu1 %vm148_vm1, %v145_v15 }
 0x145   :  { %1227 = vmatpush3.xpose.msk.msra.mxu1 %vm148_vm1, %v145_v15 }
 0x148   :  { %1229 = vmatmul.mubr.msk.f32.vlgmr.msra.gmra.mxu1 %vm148_vm1, %v1439_v10 }
 0x208   :  { %v1230_v19 = vpop.f32.mrf.mxu1 }
 0x209   :  { %v233_v20 = vmul.f32 0.35355338, %v1230_v19 }
 0x20a   :  { %v223_v21 = vpop.f32.mrf.mxu1 }
 0x20b   :  { %v232_v22 = vmul.f32 0.35355338, %v223_v21  ;;  %v235_v23 = vsel %vm141_vm3, %v233_v20, -1e+09 }
 0x20c   :  { %v240_v24 = vsel %vm236_vm2, %v235_v23, -inf }
 0x20d   :  { %241 = vmax.xlane.f32.xlu1 %v240_v24  ;;  %v234_v25 = vsel %vm140_vm4, %v232_v22, -1e+09 }
 0x20e   :  { %v237_v26 = vsel %vm236_vm2, %v234_v25, -inf }
 0x20f   :  { %238 = vmax.xlane.f32.xlu0 %v237_v26 }
 0x21e   :  { %261 = vrot.lane.b32.xlu1 %v1439_v10, %s1344_s2 }
 0x222   :  { %352 = vrot.lane.b32.xlu1 %v1439_v10, %s1345_s26 }
 0x226   :  { %350 = vrot.lane.b32.xlu1 %v1444_v13, %s1345_s26 }
 0x22a   :  { %348 = vrot.lane.b32.xlu1 %v1439_v10, %s1346_s27 }
 0x296   :  { %v242_v27 = vpop.xlane.xlu1 %241 }
 0x297   :  { %v244_v28 = vsub.f32 %v235_v23, %v242_v27 }
 0x298   :  { %v239_v29 = vpop.xlane.xlu0 %238 }
 0x299   :  { %v247_v30 = vmul.f32 1.442695, %v244_v28  ;;  %v243_v31 = vsub.f32 %v234_v25, %v239_v29 }
 0x29a   :  { %v262_v32 = vpop.permute.xlu1 %261 }
 0x29b   :  { %1308 = vpow2.f32 %v247_v30  ;;  %v245_v33 = vmul.f32 1.442695, %v243_v31  ;;  %1231 = vmatprep.subr.mxu1 %v262_v32 }
 0x29c   :  { %1232 = vmatpush3.msra.mxu1 %v262_v32 }
 0x29d   :  { %1310 = vpow2.f32 %v245_v33 }
 0x29e   :  { %v353_v41 = vpop.permute.xlu1 %352 }
 0x2a2   :  { %v351_v47 = vpop.permute.xlu1 %350 }
 0x2a6   :  { %v349_v48 = vpop.permute.xlu1 %348 }
 0x2a8   :  { %v1309_v34 = vpop.eup %1308 }
 0x2a9   :  { %v252_v35 = vsel %vm236_vm2, %v1309_v34, 0.0 }
 0x2aa   :  { %v1311_v36 = vpop.eup %1310  ;;  %253 = vadd.xlane.f32.xlu0 %v252_v35 }
 0x2ab   :  { %v249_v37 = vsel %vm236_vm2, %v1311_v36, 0.0 }
 0x2ae   :  { %250 = vadd.xlane.f32.xlu0 %v249_v37 }
 0x2c4   :  { %259 = vrot.lane.b32.xlu0 %v1444_v13, %s1344_s2 }
 0x2c8   :  { %346 = vrot.lane.b32.xlu0 %v1444_v13, %s1346_s27 }
 0x333   :  { %v254_v38 = vpop.xlane.xlu0 %253 }
 0x334   :  { %1312 = vrcp.f32 %v254_v38 }
 0x337   :  { %v251_v39 = vpop.xlane.xlu0 %250 }
 0x338   :  { %1314 = vrcp.f32 %v251_v39 }
 0x33b   :  { %v260_v40 = vpop.permute.xlu0 %259 }
 0x33c   :  { %1233 = vmatprep.subr.mxu1 %v260_v40 }
 0x33d   :  { %1234 = vmatpush3.msra.mxu1 %v260_v40 }
 0x33e   :  { %1238 = vmatprep.subr.msk.mxu1 %vm148_vm1, %v353_v41 }
 0x33f   :  { %v347_v46 = vpop.permute.xlu0 %346 }
 0x341   :  { %v1313_v42 = vpop.eup %1312 }
 0x342   :  { %v258_v45 = vmul.f32 %v1313_v42, %v1309_v34 }
 0x345   :  { %v1315_v43 = vpop.eup %1314 }
 0x346   :  { %v257_v44 = vmul.f32 %v1315_v43, %v1311_v36 }
 0x348   :  { %1235 = vmatprep.mubr.msk.f32.mxu1 %vm236_vm2, %v257_v44 }
 0x349   :  { %1236 = vmatmul.mubr.msk.f32.vlgmr.msra.gmra.mxu1 %vm236_vm2, %v258_v45 }
 0x34a   :  { %1239 = vmatpush3.xpose.msk.msra.mxu1 %vm148_vm1, %v353_v41  ;;  %1242 = vmatprep.mubr.msk.f32.mxu1 %vm148_vm1, %v347_v46 }
 0x34b   :  { %1240 = vmatprep.subr.msk.mxu1 %vm148_vm1, %v351_v47 }
 0x34e   :  { %1241 = vmatpush3.xpose.msk.msra.mxu1 %vm148_vm1, %v351_v47 }
 0x351   :  { %1243 = vmatmul.mubr.msk.f32.vlgmr.msra.gmra.mxu1 %vm148_vm1, %v349_v48 }
 0x409   :  { %v1493_v49 = vpop.f32.mrf.mxu1 }
 0x40b   :  { %v1495_v50 = vpop.f32.mrf.mxu1 }
 0x411   :  { %v1244_v51 = vpop.f32.mrf.mxu1 }
 0x412   :  { %v438_v52 = vmul.f32 0.35355338, %v1244_v51 }
 0x413   :  { %v428_v53 = vpop.f32.mrf.mxu1 }
 0x414   :  { %v437_v54 = vmul.f32 0.35355338, %v428_v53  ;;  %v440_v55 = vsel %vm141_vm3, %v438_v52, -1e+09 }
 0x415   :  { %v444_v56 = vsel %vm236_vm2, %v440_v55, -inf }
 0x416   :  { %445 = vmax.xlane.f32.xlu1 %v444_v56  ;;  %v439_v57 = vsel %vm140_vm4, %v437_v54, -1e+09 }
 0x417   :  { %v441_v58 = vsel %vm236_vm2, %v439_v57, -inf }
 0x418   :  { %442 = vmax.xlane.f32.xlu0 %v441_v58 }
 0x427   :  { %465 = vrot.lane.b32.xlu1 %v1439_v10, %s1347_s28 }
 0x42b   :  { %556 = vrot.lane.b32.xlu1 %v1439_v10, %s1348_s29 }
 0x42f   :  { %554 = vrot.lane.b32.xlu1 %v1444_v13, %s1348_s29 }
 0x433   :  { %552 = vrot.lane.b32.xlu1 %v1439_v10, %s1349_s30 }
 0x49f   :  { %v446_v59 = vpop.xlane.xlu1 %445 }
 0x4a0   :  { %v448_v60 = vsub.f32 %v440_v55, %v446_v59 }
 0x4a1   :  { %v443_v61 = vpop.xlane.xlu0 %442 }
 0x4a2   :  { %v451_v62 = vmul.f32 1.442695, %v448_v60  ;;  %v447_v63 = vsub.f32 %v439_v57, %v443_v61 }
 0x4a3   :  { %v466_v0 = vpop.permute.xlu1 %465 }
 0x4a4   :  { %1316 = vpow2.f32 %v451_v62  ;;  %v449_v1 = vmul.f32 1.442695, %v447_v63  ;;  %1245 = vmatprep.subr.mxu0 %v466_v0 }
 0x4a5   :  { %1246 = vmatpush3.msra.mxu0 %v466_v0 }
 0x4a6   :  { %1318 = vpow2.f32 %v449_v1 }
 0x4a7   :  { %v557_v12 = vpop.permute.xlu1 %556 }
 0x4ab   :  { %v555_v22 = vpop.permute.xlu1 %554 }
 0x4af   :  { %v553_v23 = vpop.permute.xlu1 %552 }
 0x4b1   :  { %v1317_v3 = vpop.eup %1316 }
 0x4b2   :  { %v456_v4 = vsel %vm236_vm2, %v1317_v3, 0.0 }
 0x4b3   :  { %v1319_v6 = vpop.eup %1318  ;;  %457 = vadd.xlane.f32.xlu0 %v456_v4 }
 0x4b4   :  { %v453_v7 = vsel %vm236_vm2, %v1319_v6, 0.0 }
 0x4b7   :  { %454 = vadd.xlane.f32.xlu0 %v453_v7 }
 0x4cd   :  { %463 = vrot.lane.b32.xlu0 %v1444_v13, %s1347_s28 }
 0x4d1   :  { %550 = vrot.lane.b32.xlu0 %v1444_v13, %s1349_s30 }
 0x53c   :  { %v458_v8 = vpop.xlane.xlu0 %457 }
 0x53d   :  { %1320 = vrcp.f32 %v458_v8 }
 0x540   :  { %v455_v9 = vpop.xlane.xlu0 %454 }
 0x541   :  { %1322 = vrcp.f32 %v455_v9 }
 0x544   :  { %v464_v11 = vpop.permute.xlu0 %463 }
 0x545   :  { %1247 = vmatprep.subr.mxu0 %v464_v11 }
 0x546   :  { %1248 = vmatpush3.msra.mxu0 %v464_v11 }
 0x547   :  { %1252 = vmatprep.subr.msk.mxu0 %vm148_vm1, %v557_v12 }
 0x548   :  { %v551_v21 = vpop.permute.xlu0 %550 }
 0x54a   :  { %v1321_v14 = vpop.eup %1320 }
 0x54b   :  { %v462_v20 = vmul.f32 %v1321_v14, %v1317_v3 }
 0x54e   :  { %v1323_v15 = vpop.eup %1322 }
 0x54f   :  { %v461_v19 = vmul.f32 %v1323_v15, %v1319_v6 }
 0x551   :  { %1249 = vmatprep.mubr.msk.f32.mxu0 %vm236_vm2, %v461_v19 }
 0x552   :  { %1250 = vmatmul.mubr.msk.f32.vlgmr.msra.gmra.mxu0 %vm236_vm2, %v462_v20 }
 0x553   :  { %1253 = vmatpush3.xpose.msk.msra.mxu0 %vm148_vm1, %v557_v12  ;;  %1256 = vmatprep.mubr.msk.f32.mxu0 %vm148_vm1, %v551_v21 }
 0x554   :  { %1254 = vmatprep.subr.msk.mxu0 %vm148_vm1, %v555_v22 }
 0x557   :  { %1255 = vmatpush3.xpose.msk.msra.mxu0 %vm148_vm1, %v555_v22 }
 0x55a   :  { %1257 = vmatmul.mubr.msk.f32.vlgmr.msra.gmra.mxu0 %vm148_vm1, %v553_v23 }
 0x612   :  { %v1521_v24 = vpop.f32.mrf.mxu0 }
 0x614   :  { %v1523_v25 = vpop.f32.mrf.mxu0 }
 0x61a   :  { %v1258_v26 = vpop.f32.mrf.mxu0 }
 0x61b   :  { %v642_v27 = vmul.f32 0.35355338, %v1258_v26  ;;  %v990_v26 = vld [vmem:[%s1613_s5 + $0x8] sm:$0xff] }
 0x61c   :  { %v632_v28 = vpop.f32.mrf.mxu0 }
 0x61d   :  { %v641_v29 = vmul.f32 0.35355338, %v632_v28  ;;  %v644_v30 = vsel %vm141_vm3, %v642_v27, -1e+09  ;;  %v989_v27 = vld [vmem:[%s1613_s5] sm:$0xff] }
 0x61e   :  { %v648_v31 = vsel %vm236_vm2, %v644_v30, -inf }
 0x61f   :  { %649 = vmax.xlane.f32.xlu1 %v648_v31  ;;  %v643_v32 = vsel %vm140_vm4, %v641_v29, -1e+09 }
 0x620   :  { %v645_v33 = vsel %vm236_vm2, %v643_v32, -inf }
 0x621   :  { %646 = vmax.xlane.f32.xlu0 %v645_v33 }
 0x630   :  { %669 = vrot.lane.b32.xlu1 %v1439_v10, %s1350_s10 }
 0x634   :  { %760 = vrot.lane.b32.xlu1 %v1439_v10, %s1351_s11 }
 0x638   :  { %758 = vrot.lane.b32.xlu1 %v1444_v13, %s1351_s11 }
 0x63c   :  { %756 = vrot.lane.b32.xlu1 %v1439_v10, %s1352_s12 }
 0x6a8   :  { %v650_v34 = vpop.xlane.xlu1 %649 }
 0x6a9   :  { %v652_v35 = vsub.f32 %v644_v30, %v650_v34 }
 0x6aa   :  { %v647_v36 = vpop.xlane.xlu0 %646 }
 0x6ab   :  { %v655_v37 = vmul.f32 1.442695, %v652_v35  ;;  %v651_v38 = vsub.f32 %v643_v32, %v647_v36 }
 0x6ac   :  { %v670_v39 = vpop.permute.xlu1 %669 }
 0x6ad   :  { %1324 = vpow2.f32 %v655_v37  ;;  %v653_v40 = vmul.f32 1.442695, %v651_v38  ;;  %1259 = vmatprep.subr.mxu1 %v670_v39 }
 0x6ae   :  { %1260 = vmatpush3.msra.mxu1 %v670_v39 }
 0x6af   :  { %1326 = vpow2.f32 %v653_v40 }
 0x6b0   :  { %v761_v48 = vpop.permute.xlu1 %760 }
 0x6b4   :  { %v759_v56 = vpop.permute.xlu1 %758 }
 0x6b8   :  { %v757_v57 = vpop.permute.xlu1 %756 }
 0x6ba   :  { %v1325_v41 = vpop.eup %1324 }
 0x6bb   :  { %v660_v42 = vsel %vm236_vm2, %v1325_v41, 0.0 }
 0x6bc   :  { %v1327_v43 = vpop.eup %1326  ;;  %661 = vadd.xlane.f32.xlu0 %v660_v42 }
 0x6bd   :  { %v657_v44 = vsel %vm236_vm2, %v1327_v43, 0.0 }
 0x6c0   :  { %658 = vadd.xlane.f32.xlu0 %v657_v44 }
 0x6d6   :  { %667 = vrot.lane.b32.xlu0 %v1444_v13, %s1350_s10 }
 0x6da   :  { %754 = vrot.lane.b32.xlu0 %v1444_v13, %s1352_s12 }
 0x745   :  { %v662_v45 = vpop.xlane.xlu0 %661 }
 0x746   :  { %1328 = vrcp.f32 %v662_v45 }
 0x749   :  { %v659_v46 = vpop.xlane.xlu0 %658 }
 0x74a   :  { %1330 = vrcp.f32 %v659_v46 }
 0x74d   :  { %v668_v47 = vpop.permute.xlu0 %667 }
 0x74e   :  { %1261 = vmatprep.subr.mxu1 %v668_v47 }
 0x74f   :  { %1262 = vmatpush3.msra.mxu1 %v668_v47 }
 0x750   :  { %1266 = vmatprep.subr.msk.mxu1 %vm148_vm1, %v761_v48 }
 0x751   :  { %v755_v55 = vpop.permute.xlu0 %754 }
 0x753   :  { %v1329_v51 = vpop.eup %1328 }
 0x754   :  { %v666_v54 = vmul.f32 %v1329_v51, %v1325_v41 }
 0x757   :  { %v1331_v52 = vpop.eup %1330 }
 0x758   :  { %v665_v53 = vmul.f32 %v1331_v52, %v1327_v43 }
 0x75a   :  { %1263 = vmatprep.mubr.msk.f32.mxu1 %vm236_vm2, %v665_v53 }
 0x75b   :  { %1264 = vmatmul.mubr.msk.f32.vlgmr.msra.gmra.mxu1 %vm236_vm2, %v666_v54 }
 0x75c   :  { %1267 = vmatpush3.xpose.msk.msra.mxu1 %vm148_vm1, %v761_v48  ;;  %1270 = vmatprep.mubr.msk.f32.mxu1 %vm148_vm1, %v755_v55 }
 0x75d   :  { %1268 = vmatprep.subr.msk.mxu1 %vm148_vm1, %v759_v56 }
 0x760   :  { %1269 = vmatpush3.xpose.msk.msra.mxu1 %vm148_vm1, %v759_v56 }
 0x763   :  { %1271 = vmatmul.mubr.msk.f32.vlgmr.msra.gmra.mxu1 %vm148_vm1, %v757_v57 }
 0x81b   :  { %v1265_v58 = vpop.f32.mrf.mxu1 }
 0x81d   :  { %v745_v59 = vpop.f32.mrf.mxu1 }
 0x823   :  { %v1272_v60 = vpop.f32.mrf.mxu1 }
 0x824   :  { %v846_v61 = vmul.f32 0.35355338, %v1272_v60 }
 0x825   :  { %v836_v62 = vpop.f32.mrf.mxu1 }
 0x826   :  { %v845_v63 = vmul.f32 0.35355338, %v836_v62  ;;  %v848_v0 = vsel %vm141_vm3, %v846_v61, -1e+09 }
 0x827   :  { %v852_v1 = vsel %vm236_vm2, %v848_v0, -inf }
 0x828   :  { %853 = vmax.xlane.f32.xlu1 %v852_v1  ;;  %v847_v3 = vsel %vm140_vm4, %v845_v63, -1e+09 }
 0x829   :  { %v849_v4 = vsel %vm236_vm2, %v847_v3, -inf }
 0x82a   :  { %850 = vmax.xlane.f32.xlu0 %v849_v4 }
 0x839   :  { %873 = vrot.lane.b32.xlu1 %v1439_v10, %s1353_s13 }
 0x83d   :  { %960 = vrot.lane.b32.xlu1 %v1523_v25, %s1354_s14  ;;  %v991_v25 = vld [vmem:[%s1613_s5 + $0x10] sm:$0xff] }
 0x841   :  { %962 = vrot.lane.b32.xlu1 %v1521_v24, %s1354_s14 }
 0x845   :  { %970 = vrot.lane.b32.xlu1 %v1265_v58, %s1355_s15 }
 0x8b1   :  { %v854_v18 = vpop.xlane.xlu1 %853 }
 0x8b2   :  { %v856_v6 = vsub.f32 %v848_v0, %v854_v18 }
 0x8b3   :  { %v851_v7 = vpop.xlane.xlu0 %850 }
 0x8b4   :  { %v859_v8 = vmul.f32 1.442695, %v856_v6  ;;  %v855_v9 = vsub.f32 %v847_v3, %v851_v7 }
 0x8b5   :  { %v874_v16 = vpop.permute.xlu1 %873 }
 0x8b6   :  { %1332 = vpow2.f32 %v859_v8  ;;  %v857_v17 = vmul.f32 1.442695, %v855_v9  ;;  %1273 = vmatprep.subr.mxu0 %v874_v16 }
 0x8b7   :  { %1274 = vmatpush3.msra.mxu0 %v874_v16  ;;  %v1167_v16 = vld [vmem:[%s1615_s7] ss:$0 sm:$0xff] }
 0x8b8   :  { %1334 = vpow2.f32 %v857_v17 }
 0x8b9   :  { %v961_v30 = vpop.permute.xlu1 %960 }
 0x8ba   :  { %v982_v34 = vsel %vm148_vm1, %v1495_v50, %v961_v30  ;;  %v1164_v50 = vld [vmem:[%s1614_s6] ss:$0 sm:$0xff] }
 0x8bd   :  { %v963_v31 = vpop.permute.xlu1 %962 }
 0x8be   :  { %v983_v36 = vsel %vm148_vm1, %v1493_v49, %v963_v31 }
 0x8c1   :  { %v971_v32 = vpop.permute.xlu1 %970 }
 0x8c2   :  { %v985_v39 = vsel %vm236_vm2, %v983_v36, %v971_v32 }
 0x8c3   :  { %v1333_v11 = vpop.eup %1332 }
 0x8c4   :  { %v864_v10 = vsel %vm236_vm2, %v1333_v11, 0.0 }
 0x8c5   :  { %v1335_v12 = vpop.eup %1334  ;;  %865 = vadd.xlane.f32.xlu0 %v864_v10  ;;  %v1168_v10 = vld [vmem:[%s1616_s8] ss:$0 sm:$0xff] }
 0x8c6   :  { %v861_v14 = vsel %vm236_vm2, %v1335_v12, 0.0 }
 0x8c9   :  { %862 = vadd.xlane.f32.xlu0 %v861_v14 }
 0x8df   :  { %871 = vrot.lane.b32.xlu0 %v1444_v13, %s1353_s13  ;;  %v992_v13 = vld [vmem:[%s1613_s5 + $0x18] sm:$0xff] }
 0x8e3   :  { %968 = vrot.lane.b32.xlu0 %v745_v59, %s1355_s15 }
 0x94e   :  { %v866_v15 = vpop.xlane.xlu0 %865 }
 0x94f   :  { %1336 = vrcp.f32 %v866_v15 }
 0x952   :  { %v863_v19 = vpop.xlane.xlu0 %862 }
 0x953   :  { %1338 = vrcp.f32 %v863_v19 }
 0x956   :  { %v872_v20 = vpop.permute.xlu0 %871 }
 0x957   :  { %1275 = vmatprep.subr.mxu0 %v872_v20 }
 0x958   :  { %1276 = vmatpush3.msra.mxu0 %v872_v20 }
 0x959   :  { %1280 = vmatprep.subr.mxu0 %v992_v13 }
 0x95a   :  { %v969_v33 = vpop.permute.xlu0 %968 }
 0x95b   :  { %v984_v37 = vsel %vm236_vm2, %v982_v34, %v969_v33 }
 0x95c   :  { %v1337_v21 = vpop.eup %1336 }
 0x95d   :  { %v870_v24 = vmul.f32 %v1337_v21, %v1333_v11 }
 0x960   :  { %v1339_v22 = vpop.eup %1338 }
 0x961   :  { %v869_v23 = vmul.f32 %v1339_v22, %v1335_v12 }
 0x963   :  { %1277 = vmatprep.mubr.msk.f32.mxu0 %vm236_vm2, %v869_v23 }
 0x964   :  { %1278 = vmatmul.mubr.msk.f32.vlgmr.msra.gmra.mxu0 %vm236_vm2, %v870_v24 }
 0x965   :  { %1281 = vmatpush3.msra.mxu0 %v992_v13 }
 0x966   :  { %1282 = vmatprep.subr.mxu0 %v991_v25 }
 0x967   :  { %1283 = vmatpush3.msra.mxu0 %v991_v25 }
 0x968   :  { %1284 = vmatprep.subr.mxu0 %v990_v26 }
 0x969   :  { %1285 = vmatpush3.msra.mxu0 %v990_v26 }
 0x96a   :  { %1286 = vmatprep.subr.mxu0 %v989_v27 }
 0x96b   :  { %1287 = vmatpush3.msra.mxu0 %v989_v27 }
 0xa24   :  { %v1279_v28 = vpop.f32.mrf.mxu0 }
 0xa25   :  { %978 = vrot.lane.b32.xlu1 %v1279_v28, %s1356_s3 }
 0xa26   :  { %v949_v29 = vpop.f32.mrf.mxu0 }
 0xa27   :  { %976 = vrot.lane.b32.xlu0 %v949_v29, %s1356_s3 }
 0xa97   :  { %v979_v35 = vpop.permute.xlu1 %978 }
 0xa98   :  { %v988_v41 = vsel %vm986_vm5, %v985_v39, %v979_v35 }
 0xa99   :  { %v977_v38 = vpop.permute.xlu0 %976 }
 0xa9a   :  { %v987_v40 = vsel %vm986_vm5, %v984_v37, %v977_v38 }
 0xa9b   :  { %1288 = vmatprep.mubr.msk.f32.mxu0 %vm45_vm0, %v987_v40 }
 0xa9c   :  { %1289 = vmatmul.mubr.msk.f32.vlgmr.msra.gmra.mxu0 %vm45_vm0, %v988_v41 }
 0xb5c   :  { %v1290_v42 = vpop.f32.mrf.mxu0 }
 0xb5d   :  { %v1078_v43 = vadd.f32 %v1290_v42, %v1164_v50 }
 0xb5e   :  { %v1072_v44 = vpop.f32.mrf.mxu0 }
 0xb5f   :  { %v1082_v49 = vadd.f32 %v1078_v43, %v1429_v5  ;;  %v1073_v45 = vadd.f32 %v1164_v50, %v1072_v44 }
 0xb61   :  { %v1081_v46 = vadd.f32 %v1073_v45, %v1416_v2  ;;  %v1086_v47 = vsel %vm45_vm0, %v1082_v49, 0.0 }
 0xb63   :  { %v1085_v48 = vsel %vm45_vm0, %v1081_v46, 0.0 }
 0xb64   :  { %v1087_v51 = vadd.f32 %v1086_v47, %v1085_v48 }
 0xb66   :  { %v1088_v52 = vrot.slane %v1087_v51, 4 }
 0xb68   :  { %v1089_v53 = vadd.f32 %v1088_v52, %v1087_v51 }
 0xb6a   :  { %v1090_v54 = vrot.slane %v1089_v53, 2 }
 0xb6c   :  { %v1091_v55 = vadd.f32 %v1090_v54, %v1089_v53 }
 0xb6e   :  { %v1092_v56 = vrot.slane %v1091_v55, 1 }
 0xb70   :  { %v1093_v57 = vadd.f32 %v1092_v56, %v1091_v55 }
 0xb72   :  { %v1095_v58 = vmul.f32 0.0625, %v1093_v57 }
 0xb74   :  { %v1096_v59 = vsub.f32 %v1081_v46, %v1095_v58  ;;  %v1097_v60 = vsub.f32 %v1082_v49, %v1095_v58 }
 0xb76   :  { %v1098_v61 = vmul.f32 %v1096_v59, %v1096_v59  ;;  %v1099_v62 = vmul.f32 %v1097_v60, %v1097_v60 }
 0xb78   :  { %v1100_v5 = vsel %vm45_vm0, %v1098_v61, 0.0  ;;  %v1101_v2 = vsel %vm45_vm0, %v1099_v62, 0.0 }
 0xb79   :  { %v1102_v63 = vadd.f32 %v1101_v2, %v1100_v5 }
 0xb7b   :  { %v1103_v0 = vrot.slane %v1102_v63, 4 }
 0xb7d   :  { %v1104_v1 = vadd.f32 %v1103_v0, %v1102_v63 }
 0xb7f   :  { %v1105_v3 = vrot.slane %v1104_v1, 2 }
 0xb81   :  { %v1106_v4 = vadd.f32 %v1105_v3, %v1104_v1 }
 0xb83   :  { %v1107_v18 = vrot.slane %v1106_v4, 1 }
 0xb85   :  { %v1108_v6 = vadd.f32 %v1107_v18, %v1106_v4 }
 0xb87   :  { %v1109_v7 = vmul.f32 0.0625, %v1108_v6 }
 0xb89   :  { %v1110_v8 = vadd.f32 1e-05, %v1109_v7 }
 0xb8b   :  { %1340 = vrsqrt.f32 %v1110_v8 }
 0xb98   :  { %v1341_v9 = vpop.eup %1340 }
 0xb99   :  { %v1112_v17 = vmul.f32 %v1341_v9, %v1096_v59  ;;  %v1113_v11 = vmul.f32 %v1341_v9, %v1097_v60 }
 0xb9b   :  { %v1120_v12 = vmul.f32 %v1167_v16, %v1112_v17  ;;  %v1121_v14 = vmul.f32 %v1167_v16, %v1113_v11 }
 0xb9d   :  { %v1128_v15 = vadd.f32 %v1168_v10, %v1120_v12  ;;  %v1129_v19 = vadd.f32 %v1168_v10, %v1121_v14 }
 0xb9f   :  { %1130 = vst.msk [vmem:[%s1617_s9] sm:$0xff] %vm45_vm0, %v1128_v15  ;;  %1131 = vst.msk [vmem:[%s1617_s9 + $0x8] sm:$0xff] %vm45_vm0, %v1129_v19 }

// kernel: gps_encoder_forward.13
= control target key start
LH: loop header
LB: loop body
LE: loop exit
PB: predicated region body
PF: predicated region fallthrough
CT: control target
= control target key end

     0   :  { %vm47_vm0 = vcmask 261120   ;;  %s495_s0 = inlined_call_operand.vmem [shape: f32[16,32], index: 0, kind: input, shape index: {}]   ;;  %s496_s1 = inlined_call_operand.vmem [shape: f32[16,32], index: 1, kind: input, shape index: {}]   ;;  %s497_s2 = inlined_call_operand.vmem [shape: f32[32,64], index: 2, kind: input, shape index: {}]   ;;  %s498_s3 = inlined_call_operand.vmem [shape: f32[1,64], index: 3, kind: input, shape index: {}]   ;;  %s499_s4 = inlined_call_operand.vmem [shape: f32[64,32], index: 4, kind: input, shape index: {}]   ;;  %s500_s5 = inlined_call_operand.vmem [shape: f32[1,32], index: 5, kind: input, shape index: {}]   ;;  %s501_s6 = inlined_call_operand.vmem [shape: f32[1,32], index: 6, kind: input, shape index: {}]   ;;  %s502_s7 = inlined_call_operand.vmem [shape: f32[1,32], index: 7, kind: input, shape index: {}]   ;;  %s503_s8 = inlined_call_operand.hbm [shape: f32[16,32], index: 8, kind: output, shape index: {}]  }
   0x1   :  { %v39_v0 = vld [vmem:[%s497_s2 + $0x18] sm:$0xff]  ;;  %v38_v1 = vld [vmem:[%s497_s2 + $0x10] sm:$0xff]  ;;  %v37_v2 = vld [vmem:[%s497_s2 + $0x8] sm:$0xff] }
   0x2   :  { %319 = vmatprep.subr.mxu0 %v39_v0  ;;  %v30_v3 = vld [vmem:[%s495_s0] sm:$0xff]  ;;  %v31_v6 = vld [vmem:[%s495_s0 + $0x8] sm:$0xff]  ;;  %v138_v8 = vld [vmem:[%s499_s4 + $0x38] sm:$0xff] }
   0x3   :  { %v32_v4 = vld [vmem:[%s496_s1] sm:$0xff]  ;;  %320 = vmatpush3.msra.mxu0 %v39_v0  ;;  %v33_v7 = vld [vmem:[%s496_s1 + $0x8] sm:$0xff]  ;;  %330 = vmatprep.subr.mxu1 %v138_v8  ;;  %v137_v9 = vld [vmem:[%s499_s4 + $0x30] sm:$0xff] }
   0x4   :  { %v34_v5 = vadd.f32 %v32_v4, %v30_v3  ;;  %321 = vmatprep.subr.mxu0 %v38_v1  ;;  %v36_v10 = vld [vmem:[%s497_s2] sm:$0xff] }
   0x5   :  { %322 = vmatpush3.msra.mxu0 %v38_v1 }
   0x6   :  { %327 = vmatprep.mubr.msk.f32.mxu0 %vm47_vm0, %v34_v5 }
   0x7   :  { %13 = vsyncpa [#allocation3], 0  ;;  %323 = vmatprep.subr.mxu0 %v37_v2  ;;  %v35_v11 = vadd.f32 %v33_v7, %v31_v6  ;;  %331 = vmatpush3.msra.mxu1 %v138_v8  ;;  %v136_v12 = vld [vmem:[%s499_s4 + $0x28] sm:$0xff]  ;;  %v135_v13 = vld [vmem:[%s499_s4 + $0x20] sm:$0xff]  ;;  %vm146_vm1 = vcmask 523264  }
   0x8   :  { %324 = vmatpush3.msra.mxu0 %v37_v2  ;;  %332 = vmatprep.subr.mxu1 %v137_v9  ;;  %v134_v14 = vld [vmem:[%s499_s4 + $0x18] sm:$0xff]  ;;  %v133_v15 = vld [vmem:[%s499_s4 + $0x10] sm:$0xff]  ;;  %v132_v16 = vld [vmem:[%s499_s4 + $0x8] sm:$0xff] }
   0x9   :  { %325 = vmatprep.subr.mxu0 %v36_v10  ;;  %333 = vmatpush3.msra.mxu1 %v137_v9  ;;  %v131_v17 = vld [vmem:[%s499_s4] sm:$0xff] }
   0xa   :  { %326 = vmatpush3.msra.mxu0 %v36_v10  ;;  %334 = vmatprep.subr.mxu1 %v136_v12  ;;  %v295_v18 = vld [vmem:[%s498_s3] ss:$0 sm:$0xff] }
   0xb   :  { %328 = vmatmul.mubr.msk.f32.vlgmr.msra.gmra.mxu0 %vm47_vm0, %v35_v11  ;;  %335 = vmatpush3.msra.mxu1 %v136_v12  ;;  %v298_v25 = vld [vmem:[%s500_s5] ss:$0 sm:$0xff]  ;;  %s376_s5 = smov [#allocation2]  }
   0xc   :  { %336 = vmatprep.subr.mxu1 %v135_v13  ;;  %v301_v58 = vld [vmem:[%s501_s6] ss:$0 sm:$0xff]  ;;  %s284_s16 = sshll.u32 %s376_s5, 4  ;;  %s285_s16 = int_to_ptr.vmem [resolvable:$true] %s284_s16 }
   0xd   :  { %337 = vmatpush3.msra.mxu1 %v135_v13  ;;  %v302_v61 = vld [vmem:[%s502_s7] ss:$0 sm:$0xff]  ;;  %s354_s19 = scalar_lea.vmem %s285_s16, 256  ;;  %p359_p1 = scmp.lt.s32.totalorder %s285_s16, %s285_s16 }
   0xe   :  { %338 = vmatprep.subr.mxu1 %v134_v14  ;;  %p355_p0 = scmp.ne.s32.totalorder %s285_s16, %s354_s19  ;;  %p360_p2 = scmp.lt.s32.totalorder %s354_s19, %s354_s19 }
   0xf   :  { %339 = vmatpush3.msra.mxu1 %v134_v14 }
  0x10   :  { %340 = vmatprep.subr.mxu1 %v133_v15  ;;  %p361_p3 = por %p360_p2, %p359_p1 }
  0x11   :  { %341 = vmatpush3.msra.mxu1 %v133_v15 }
  0x12   :  { %342 = vmatprep.subr.mxu1 %v132_v16  ;;  %p362_p4 = pnand %p361_p3, %p355_p0 }
  0x13   :  { %343 = vmatpush3.msra.mxu1 %v132_v16 }
  0x14   :  { %344 = vmatprep.subr.mxu1 %v131_v17 }
  0x15   :  { %345 = vmatpush3.msra.mxu1 %v131_v17 }
  0xcb   :  { %v329_v19 = vpop.f32.mrf.mxu0 }
  0xcc   :  { %v126_v20 = vadd.f32 %v329_v19, %v295_v18 }
  0xcd   :  { %v120_v21 = vpop.f32.mrf.mxu0 }
  0xce   :  { %v121_v22 = vadd.f32 %v295_v18, %v120_v21  ;;  %v130_v24 = vmax.f32 %v126_v20, 0.0 }
  0xd0   :  { %v129_v23 = vmax.f32 %v121_v22, 0.0 }
  0xd2   :  { %346 = vmatprep.mubr.msk.f32.mxu1 %vm146_vm1, %v129_v23 }
  0xd3   :  { %347 = vmatmul.mubr.msk.f32.vlgmr.msra.gmra.mxu1 %vm146_vm1, %v130_v24 }
 0x193   :  { %v348_v26 = vpop.f32.mrf.mxu1 }
 0x194   :  { %v225_v27 = vadd.f32 %v348_v26, %v298_v25 }
 0x195   :  { %v219_v28 = vpop.f32.mrf.mxu1 }
 0x196   :  { %v229_v29 = vadd.f32 %v225_v27, %v35_v11  ;;  %v220_v30 = vadd.f32 %v298_v25, %v219_v28 }
 0x198   :  { %v228_v31 = vadd.f32 %v220_v30, %v34_v5  ;;  %v233_v32 = vsel %vm47_vm0, %v229_v29, 0.0 }
 0x19a   :  { %v232_v33 = vsel %vm47_vm0, %v228_v31, 0.0 }
 0x19b   :  { %v234_v34 = vadd.f32 %v233_v32, %v232_v33 }
 0x19d   :  { %v235_v35 = vrot.slane %v234_v34, 4 }
 0x19f   :  { %v236_v36 = vadd.f32 %v235_v35, %v234_v34 }
 0x1a1   :  { %v237_v37 = vrot.slane %v236_v36, 2 }
 0x1a3   :  { %v238_v38 = vadd.f32 %v237_v37, %v236_v36 }
 0x1a5   :  { %v239_v39 = vrot.slane %v238_v38, 1 }
 0x1a7   :  { %v240_v40 = vadd.f32 %v239_v39, %v238_v38 }
 0x1a9   :  { %v242_v41 = vmul.f32 0.0625, %v240_v40 }
 0x1ab   :  { %v243_v42 = vsub.f32 %v228_v31, %v242_v41  ;;  %v244_v43 = vsub.f32 %v229_v29, %v242_v41 }
 0x1ad   :  { %v245_v44 = vmul.f32 %v243_v42, %v243_v42  ;;  %v246_v45 = vmul.f32 %v244_v43, %v244_v43 }
 0x1af   :  { %v247_v46 = vsel %vm47_vm0, %v245_v44, 0.0  ;;  %v248_v47 = vsel %vm47_vm0, %v246_v45, 0.0 }
 0x1b0   :  { %v249_v48 = vadd.f32 %v248_v47, %v247_v46 }
 0x1b2   :  { %v250_v49 = vrot.slane %v249_v48, 4 }
 0x1b4   :  { %v251_v50 = vadd.f32 %v250_v49, %v249_v48 }
 0x1b6   :  { %v252_v51 = vrot.slane %v251_v50, 2 }
 0x1b8   :  { %v253_v52 = vadd.f32 %v252_v51, %v251_v50 }
 0x1ba   :  { %v254_v53 = vrot.slane %v253_v52, 1 }
 0x1bc   :  { %v255_v54 = vadd.f32 %v254_v53, %v253_v52 }
 0x1be   :  { %v256_v55 = vmul.f32 0.0625, %v255_v54 }
 0x1c0   :  { %v257_v56 = vadd.f32 1e-05, %v256_v55 }
 0x1c2   :  { %352 = vrsqrt.f32 %v257_v56 }
 0x1cf   :  { %v353_v57 = vpop.eup %352 }
 0x1d0   :  { %v259_v59 = vmul.f32 %v353_v57, %v243_v42  ;;  %v260_v60 = vmul.f32 %v353_v57, %v244_v43 }
 0x1d2   :  { %v267_v62 = vmul.f32 %v301_v58, %v259_v59  ;;  %v268_v63 = vmul.f32 %v301_v58, %v260_v60 }
 0x1d4   :  { %v275_v0 = vadd.f32 %v302_v61, %v267_v62  ;;  %v276_v1 = vadd.f32 %v302_v61, %v268_v63 }
 0x1d6   :  { %277 = vst.msk [vmem:[#allocation2] sm:$0xff] %vm47_vm0, %v275_v0  ;;  %278 = vst.msk [vmem:[#allocation2 + $0x8] sm:$0xff] %vm47_vm0, %v276_v1 }
 0x1d7   :  { %365 = shalt.err (!%p362_p4)
}
 0x1d8   :  { %s377_s6 = smov 128   ;;  %s378_s20 = smov 8  }
 0x1d9   :  { %290 = dma.vmem_to_hbm [thread:$0]  %s285_s16, 256, %s503_s8, [#allocation3], %s377_s6, %s377_s6, %s378_s20  }
 0x1da   :  { %374 = dma.done.wait [#allocation3], 256  }
 0x1db   :  { %375 = vsyncadd [#allocation3], 4294967040 }
 0x1dc   :  { %294 = vsyncpa [#allocation3], 1 }

</bundles_post_ra>
